<compile_context>
chip_gen: v7x
topology: tpu7x:2x2x1
jax: 0.10.0
libtpu: 0.0.40
codegen_flags: <defaults>
</compile_context>

<pallas_src>
import functools

import jax
import jax.numpy as jnp
import numpy as np
from jax import lax
from jax.experimental import pallas as pl
from jax.experimental.pallas import tpu as pltpu

_BN_EPS = 1e-5


# ----------------------------------------------------------------------------
# Lane layout helpers (numpy, trace-time constants).
# Lane l of a stage-s slab holds (n, c, w) with  l = (n*C + c)*s + w ;
# the sublane (row) axis is the spatial height h.
# ----------------------------------------------------------------------------
def _lane_idx(s, n_batch, n_chan):
    lane = np.arange(n_batch * n_chan * s)
    img = lane // s
    return img // n_chan, img % n_chan, lane % s          # n, c, w   (each (L,))


def _row_shift_mats(s):
    """(2, s, s): [0] = shift-down (row h reads h-1), [1] = shift-up (row h reads h+1).
    These give the vertical zero halo without any padded scratch / masked stores."""
    r = np.arange(s)
    sd = (r[None, :] == r[:, None] - 1).astype(np.float32)
    su = (r[None, :] == r[:, None] + 1).astype(np.float32)
    return jnp.asarray(np.stack([sd, su]))


def _depthsep_mats(dw, pw, s, n_batch, n_chan):
    """Fold depthwise 3x3 (no bias) + pointwise 1x1 (no bias) into three
    per-row-offset lane-mixing matrices A_kh (L, L):
        y[h, dst] = sum_kh (row h+kh-1 of x, zero vertically) @ A_kh
    Horizontal zero padding and the per-sample channel mix are encoded in A_kh."""
    n, c, w = _lane_idx(s, n_batch, n_chan)
    L = n.size
    c_src = np.broadcast_to(c[:, None], (L, L))
    c_dst = np.broadcast_to(c[None, :], (L, L))
    kw = w[:, None] - w[None, :] + 1                      # source col - dest col + 1
    valid = jnp.asarray((n[:, None] == n[None, :]) & (kw >= 0) & (kw <= 2))
    kwc = np.clip(kw, 0, 2)
    pw_mix = pw[c_dst, c_src]                             # pw[c_out, c_in] per lane pair
    mats = []
    for kh in range(3):
        tap = dw[:, kh, :][c_src, kwc]                    # dw[c_in, kh, kw] per lane pair
        mats.append(jnp.where(valid, tap * pw_mix, 0.0))
    return jnp.stack(mats).astype(jnp.float32)            # (3, L, L)


def _dense_conv_mats(w3, s, n_batch, n_chan):
    """Dense 3x3 conv (padding 1) as three per-row-offset matrices B_kh (L, L)."""
    n, c, w = _lane_idx(s, n_batch, n_chan)
    L = n.size
    c_src = np.broadcast_to(c[:, None], (L, L))
    c_dst = np.broadcast_to(c[None, :], (L, L))
    kw = w[:, None] - w[None, :] + 1
    valid = jnp.asarray((n[:, None] == n[None, :]) & (kw >= 0) & (kw <= 2))
    kwc = np.clip(kw, 0, 2)
    mats = []
    for kh in range(3):
        tap = w3[:, :, kh, :][c_dst, c_src, kwc]          # w3[c_out, c_in, kh, kw]
        mats.append(jnp.where(valid, tap, 0.0))
    return jnp.stack(mats).astype(jnp.float32)            # (3, L, L)


def _bn_mats(gamma, beta, s, n_batch, n_chan):
    """Same-channel indicator (L, L) for the reduce+broadcast matmul, plus the
    per-lane gamma/beta rows (2, L)."""
    _, c, _ = _lane_idx(s, n_batch, n_chan)
    p = jnp.asarray((c[:, None] == c[None, :]).astype(np.float32))
    gb = jnp.stack([gamma[c], beta[c]]).astype(jnp.float32)
    return p, gb


def _pool_mats(s, n_batch, n_chan):
    """AvgPool2d(2,2):  out = Vp @ x @ Hp   (lane-batched over all N*C images)."""
    so = s // 2
    vp = 0.5 * (np.arange(s)[None, :] // 2 == np.arange(so)[:, None]).astype(np.float32)
    L, Lo = n_batch * n_chan * s, n_batch * n_chan * so
    i, j = np.arange(L)[:, None], np.arange(Lo)[None, :]
    hp = 0.5 * ((i // s == j // so) & ((i % s) // 2 == j % so)).astype(np.float32)
    return jnp.asarray(vp), jnp.asarray(hp)


def _upsample_mats(s, n_batch, n_chan):
    """Nearest-neighbour x4 upsample:  out = Uv @ x @ Uw."""
    so = 4 * s
    uv = (np.arange(so)[:, None] // 4 == np.arange(s)[None, :]).astype(np.float32)
    L, Lo = n_batch * n_chan * s, n_batch * n_chan * so
    i, j = np.arange(L)[:, None], np.arange(Lo)[None, :]
    uw = ((i // s == j // so) & ((j % so) // 4 == i % s)).astype(np.float32)
    return jnp.asarray(uv), jnp.asarray(uw)


# ----------------------------------------------------------------------------
# Fused forward kernel (single grid step, everything VMEM-resident)
# ----------------------------------------------------------------------------
def _attention_pathway_kernel(
    x_ref,                                                    # (H, N*C*W) input slab
    a1_ref, sh1_ref, p1_ref, gb1_ref, vp1_ref, hp1_ref,       # block 1
    a2_ref, sh2_ref, p2_ref, gb2_ref, vp2_ref, hp2_ref,       # block 2
    b3_ref, sh3_ref, bias3_ref, p3_ref, gb3_ref,              # attention conv + BN
    uv_ref, uw_ref,                                           # x4 nearest upsample
    out_ref,                                                  # (H, N*C*W) output slab
    *, n_batch,
):
    f32 = jnp.float32

    def conv3(a, m_ref, sh_ref, bias=None):
        # a: (s, L) slab.  m_ref: (3, L, L) fused lane-mixing matrices (per row
        # offset).  sh_ref: (2, s, s) row shift-down / shift-up (vertical zero halo).
        acc = jnp.dot(a, m_ref[1], preferred_element_type=f32)
        up = jnp.dot(sh_ref[0], a, preferred_element_type=f32)       # row h-1
        dn = jnp.dot(sh_ref[1], a, preferred_element_type=f32)       # row h+1
        acc = acc + jnp.dot(up, m_ref[0], preferred_element_type=f32)
        acc = acc + jnp.dot(dn, m_ref[2], preferred_element_type=f32)
        if bias is not None:
            acc = acc + bias
        return acc

    def batchnorm(y, p_ref, gb_ref):
        # Training-mode BN, single pass: per-channel sum / sum-of-squares over
        # (N, H, W).  One (1,L)@(L,L) matmul against the same-channel indicator both
        # reduces across lanes and broadcasts the statistic back to every lane.
        s = y.shape[0]
        inv_cnt = 1.0 / float(n_batch * s * s)
        sum_r = jnp.sum(y, axis=0, keepdims=True)                     # (1, L)
        sumsq_r = jnp.sum(y * y, axis=0, keepdims=True)               # (1, L)
        mean = jnp.dot(sum_r, p_ref[...], preferred_element_type=f32) * inv_cnt
        ex2 = jnp.dot(sumsq_r, p_ref[...], preferred_element_type=f32) * inv_cnt
        var = ex2 - mean * mean                                       # one-pass variance
        gb = gb_ref[...]
        scale = gb[0:1, :] * lax.rsqrt(var + _BN_EPS)                 # rsqrt on the EUP
        shift = gb[1:2, :] - mean * scale
        return y * scale + shift

    def avgpool(y, vp_ref, hp_ref):
        return jnp.dot(jnp.dot(vp_ref[...], y, preferred_element_type=f32),
                       hp_ref[...], preferred_element_type=f32)

    y = x_ref[...]                                                    # (16, 128)

    # Blocks[0]: DepthSepConv -> BatchNorm (batch stats) -> AvgPool2d(2,2)
    y = avgpool(batchnorm(conv3(y, a1_ref, sh1_ref), p1_ref, gb1_ref),
                vp1_ref, hp1_ref)                                     # (8, 64)

    # Blocks[1]: DepthSepConv -> BatchNorm -> AvgPool2d(2,2)
    y = avgpool(batchnorm(conv3(y, a2_ref, sh2_ref), p2_ref, gb2_ref),
                vp2_ref, hp2_ref)                                     # (4, 32)

    # attention_blocks: Conv2d(3x3, pad 1, bias) -> BatchNorm
    y = batchnorm(conv3(y, b3_ref, sh3_ref, bias=bias3_ref[...]),
                  p3_ref, gb3_ref)                                    # (4, 32)
    # TODO(synk): the two AxialAttentionDynamic layers have no class definition in
    # the provided source, so they are not applied here.
    # TODO(synk): train-mode BN running_mean/running_var momentum updates are not
    # emitted (forward normalisation matches PyTorch train mode).

    # F.interpolate(scale_factor=4, mode='nearest')
    out_ref[...] = jnp.dot(jnp.dot(uv_ref[...], y, preferred_element_type=f32),
                           uw_ref[...], preferred_element_type=f32)   # (16, 128)


# ----------------------------------------------------------------------------
# Wrapper: NCHW in / NCHW out; one pallas_call; lane-dense (H, N*C*W) slab I/O
# ----------------------------------------------------------------------------
def attention_pathway_forward(feature_nchw, params):
    x = feature_nchw.astype(jnp.float32)
    N, C, H, W = x.shape
    assert H == W and H % 4 == 0, "square spatial dims divisible by 4 required"
    assert len(params["blocks"]) == 2, "kernel is specialised to n_of_layer=2"
    s1, s2, s3 = H, H // 2, H // 4

    # ---- fold the PyTorch weights into lane-mixing constants.  These depend only
    # on the weights (weight folding) and would be precomputed once in deployment.
    b0, b1, pa = params["blocks"][0], params["blocks"][1], params["attn"]
    dw1 = b0["dw"].reshape(C, 3, 3).astype(jnp.float32)
    pw1 = b0["pw"].reshape(C, C).astype(jnp.float32)
    dw2 = b1["dw"].reshape(C, 3, 3).astype(jnp.float32)
    pw2 = b1["pw"].reshape(C, C).astype(jnp.float32)
    w3 = pa["w"].astype(jnp.float32)
    b3 = pa["b"].astype(jnp.float32)

    a1 = _depthsep_mats(dw1, pw1, s1, N, C)
    a2 = _depthsep_mats(dw2, pw2, s2, N, C)
    bm3 = _dense_conv_mats(w3, s3, N, C)
    sh1, sh2, sh3 = _row_shift_mats(s1), _row_shift_mats(s2), _row_shift_mats(s3)
    p1, gb1 = _bn_mats(b0["bn_gamma"], b0["bn_beta"], s1, N, C)
    p2, gb2 = _bn_mats(b1["bn_gamma"], b1["bn_beta"], s2, N, C)
    p3, gb3 = _bn_mats(pa["bn_gamma"], pa["bn_beta"], s3, N, C)
    vp1, hp1 = _pool_mats(s1, N, C)
    vp2, hp2 = _pool_mats(s2, N, C)
    uv, uw = _upsample_mats(s3, N, C)
    _, c3, _ = _lane_idx(s3, N, C)
    bias3 = b3[c3].reshape(1, N * C * s3)

    # ---- lane-dense slab: (N,C,H,W) -> (H, N*C*W); last dim = 128 --------------
    x_slab = jnp.transpose(x, (2, 0, 1, 3)).reshape(H, N * C * W)

    vmem = pl.BlockSpec(memory_space=pltpu.MemorySpace.VMEM)
    out_slab = pl.pallas_call(
        functools.partial(_attention_pathway_kernel, n_batch=N),
        out_shape=jax.ShapeDtypeStruct((H, N * C * W), jnp.float32),
        in_specs=[vmem] * 20,
        out_specs=vmem,
    )(x_slab, a1, sh1, p1, gb1, vp1, hp1,
      a2, sh2, p2, gb2, vp2, hp2,
      bm3, sh3, bias3, p3, gb3, uv, uw)

    return out_slab.reshape(H, N, C, W).transpose(1, 2, 0, 3)


# ----------------------------------------------------------------------------
# Deterministic parameters (PyTorch-native weight layouts)
# ----------------------------------------------------------------------------
def make_params(key, channels, n_of_layer=2):
    C = channels
    ks = jax.random.split(key, 2 * n_of_layer + 2)
    blocks = []
    for L in range(n_of_layer):
        blocks.append({
            "dw": 0.2 * jax.random.normal(ks[2 * L], (C, 1, 3, 3), jnp.float32),      # depthwise (C,1,3,3)
            "pw": 0.2 * jax.random.normal(ks[2 * L + 1], (C, C, 1, 1), jnp.float32),  # pointwise (Cout,Cin,1,1)
            "bn_gamma": jnp.ones((C,), jnp.float32),
            "bn_beta": jnp.zeros((C,), jnp.float32),
        })
    attn = {
        "w": 0.2 * jax.random.normal(ks[-2], (C, C, 3, 3), jnp.float32),              # (Cout,Cin,3,3)
        "b": 0.1 * jax.random.normal(ks[-1], (C,), jnp.float32),
        "bn_gamma": jnp.ones((C,), jnp.float32),
        "bn_beta": jnp.zeros((C,), jnp.float32),
    }
    return {"blocks": blocks, "attn": attn}


if __name__ == "__main__":
    # inplanes = planes = 4, feature_size = 16, n_of_layer = 2
    N, C, H, W = 2, 4, 16, 16
    key = jax.random.PRNGKey(0)
    k_x, k_p = jax.random.split(key)
    x = jax.random.normal(k_x, (N, C, H, W), jnp.float32)      # NCHW, like PyTorch
    params = make_params(k_p, C, n_of_layer=2)

    fwd = jax.jit(attention_pathway_forward)
    out = jax.block_until_ready(fwd(x, params))
    assert out.shape == (N, C, H, W), out.shape
    assert bool(jnp.all(jnp.isfinite(out))), "non-finite output"
    print("KERNEL_OK")
</pallas_src>

<mosaic_0001>
module attributes {stable_mosaic.version = 11 : i64} {
  func.func @_attention_pathway_kernel(%arg0: memref<16x128xf32, #tpu.memory_space<vmem>>, %arg1: memref<3x128x128xf32, #tpu.memory_space<vmem>>, %arg2: memref<2x16x16xf32, #tpu.memory_space<vmem>>, %arg3: memref<128x128xf32, #tpu.memory_space<vmem>>, %arg4: memref<2x128xf32, #tpu.memory_space<vmem>>, %arg5: memref<8x16xf32, #tpu.memory_space<vmem>>, %arg6: memref<128x64xf32, #tpu.memory_space<vmem>>, %arg7: memref<3x64x64xf32, #tpu.memory_space<vmem>>, %arg8: memref<2x8x8xf32, #tpu.memory_space<vmem>>, %arg9: memref<64x64xf32, #tpu.memory_space<vmem>>, %arg10: memref<2x64xf32, #tpu.memory_space<vmem>>, %arg11: memref<4x8xf32, #tpu.memory_space<vmem>>, %arg12: memref<64x32xf32, #tpu.memory_space<vmem>>, %arg13: memref<3x32x32xf32, #tpu.memory_space<vmem>>, %arg14: memref<2x4x4xf32, #tpu.memory_space<vmem>>, %arg15: memref<1x32xf32, #tpu.memory_space<vmem>>, %arg16: memref<32x32xf32, #tpu.memory_space<vmem>>, %arg17: memref<2x32xf32, #tpu.memory_space<vmem>>, %arg18: memref<16x4xf32, #tpu.memory_space<vmem>>, %arg19: memref<32x128xf32, #tpu.memory_space<vmem>>, %arg20: memref<16x128xf32, #tpu.memory_space<vmem>>) attributes {dimension_semantics = [], scalar_prefetch = 0 : i64, scratch_operands = 0 : i64, tpu.core_type = #tpu.core_type<tc>} {
    %c0 = arith.constant 0 : index
    %c0_0 = arith.constant 0 : index
    %0 = vector.load %arg0[%c0, %c0_0] : memref<16x128xf32, #tpu.memory_space<vmem>>, vector<16x128xf32>
    %c1 = arith.constant 1 : index
    %c0_1 = arith.constant 0 : index
    %c0_2 = arith.constant 0 : index
    %1 = vector.load %arg1[%c1, %c0_1, %c0_2] : memref<3x128x128xf32, #tpu.memory_space<vmem>>, vector<1x128x128xf32>
    %2 = vector.shape_cast %1 : vector<1x128x128xf32> to vector<128x128xf32>
    %cst = arith.constant dense<0.000000e+00> : vector<16x128xf32>
    %3 = tpu.matmul %0, %2, %cst {dimension_numbers = #tpu.dot_dimension_numbers<[1], [0], [0], [1], [0, 0, 1, 1], [], []>} : vector<16x128xf32>, vector<128x128xf32>, vector<16x128xf32> -> vector<16x128xf32>
    %c0_3 = arith.constant 0 : index
    %c0_4 = arith.constant 0 : index
    %c0_5 = arith.constant 0 : index
    %4 = vector.load %arg2[%c0_3, %c0_4, %c0_5] : memref<2x16x16xf32, #tpu.memory_space<vmem>>, vector<1x16x16xf32>
    %5 = vector.shape_cast %4 : vector<1x16x16xf32> to vector<16x16xf32>
    %cst_6 = arith.constant dense<0.000000e+00> : vector<16x128xf32>
    %6 = tpu.matmul %5, %0, %cst_6 {dimension_numbers = #tpu.dot_dimension_numbers<[1], [0], [0], [1], [0, 0, 1, 1], [], []>} : vector<16x16xf32>, vector<16x128xf32>, vector<16x128xf32> -> vector<16x128xf32>
    %c1_7 = arith.constant 1 : index
    %c0_8 = arith.constant 0 : index
    %c0_9 = arith.constant 0 : index
    %7 = vector.load %arg2[%c1_7, %c0_8, %c0_9] : memref<2x16x16xf32, #tpu.memory_space<vmem>>, vector<1x16x16xf32>
    %8 = vector.shape_cast %7 : vector<1x16x16xf32> to vector<16x16xf32>
    %cst_10 = arith.constant dense<0.000000e+00> : vector<16x128xf32>
    %9 = tpu.matmul %8, %0, %cst_10 {dimension_numbers = #tpu.dot_dimension_numbers<[1], [0], [0], [1], [0, 0, 1, 1], [], []>} : vector<16x16xf32>, vector<16x128xf32>, vector<16x128xf32> -> vector<16x128xf32>
    %c0_11 = arith.constant 0 : index
    %c0_12 = arith.constant 0 : index
    %c0_13 = arith.constant 0 : index
    %10 = vector.load %arg1[%c0_11, %c0_12, %c0_13] : memref<3x128x128xf32, #tpu.memory_space<vmem>>, vector<1x128x128xf32>
    %11 = vector.shape_cast %10 : vector<1x128x128xf32> to vector<128x128xf32>
    %cst_14 = arith.constant dense<0.000000e+00> : vector<16x128xf32>
    %12 = tpu.matmul %6, %11, %cst_14 {dimension_numbers = #tpu.dot_dimension_numbers<[1], [0], [0], [1], [0, 0, 1, 1], [], []>} : vector<16x128xf32>, vector<128x128xf32>, vector<16x128xf32> -> vector<16x128xf32>
    %13 = arith.addf %3, %12 : vector<16x128xf32>
    %c2 = arith.constant 2 : index
    %c0_15 = arith.constant 0 : index
    %c0_16 = arith.constant 0 : index
    %14 = vector.load %arg1[%c2, %c0_15, %c0_16] : memref<3x128x128xf32, #tpu.memory_space<vmem>>, vector<1x128x128xf32>
    %15 = vector.shape_cast %14 : vector<1x128x128xf32> to vector<128x128xf32>
    %cst_17 = arith.constant dense<0.000000e+00> : vector<16x128xf32>
    %16 = tpu.matmul %9, %15, %cst_17 {dimension_numbers = #tpu.dot_dimension_numbers<[1], [0], [0], [1], [0, 0, 1, 1], [], []>} : vector<16x128xf32>, vector<128x128xf32>, vector<16x128xf32> -> vector<16x128xf32>
    %17 = arith.addf %13, %16 : vector<16x128xf32>
    %cst_18 = arith.constant dense<0.000000e+00> : vector<128xf32>
    %18 = vector.multi_reduction <add>, %17, %cst_18 [0] : vector<16x128xf32> to vector<128xf32>
    %19 = vector.shape_cast %18 : vector<128xf32> to vector<1x128xf32>
    %20 = arith.mulf %17, %17 : vector<16x128xf32>
    %cst_19 = arith.constant dense<0.000000e+00> : vector<128xf32>
    %21 = vector.multi_reduction <add>, %20, %cst_19 [0] : vector<16x128xf32> to vector<128xf32>
    %22 = vector.shape_cast %21 : vector<128xf32> to vector<1x128xf32>
    %c0_20 = arith.constant 0 : index
    %c0_21 = arith.constant 0 : index
    %23 = vector.load %arg3[%c0_20, %c0_21] : memref<128x128xf32, #tpu.memory_space<vmem>>, vector<128x128xf32>
    %cst_22 = arith.constant dense<0.000000e+00> : vector<1x128xf32>
    %24 = tpu.matmul %19, %23, %cst_22 {dimension_numbers = #tpu.dot_dimension_numbers<[1], [0], [0], [1], [0, 0, 1, 1], [], []>} : vector<1x128xf32>, vector<128x128xf32>, vector<1x128xf32> -> vector<1x128xf32>
    %cst_23 = arith.constant 0.001953125 : f32
    %25 = vector.broadcast %cst_23 : f32 to vector<1x128xf32>
    %26 = arith.mulf %24, %25 : vector<1x128xf32>
    %c0_24 = arith.constant 0 : index
    %c0_25 = arith.constant 0 : index
    %27 = vector.load %arg3[%c0_24, %c0_25] : memref<128x128xf32, #tpu.memory_space<vmem>>, vector<128x128xf32>
    %cst_26 = arith.constant dense<0.000000e+00> : vector<1x128xf32>
    %28 = tpu.matmul %22, %27, %cst_26 {dimension_numbers = #tpu.dot_dimension_numbers<[1], [0], [0], [1], [0, 0, 1, 1], [], []>} : vector<1x128xf32>, vector<128x128xf32>, vector<1x128xf32> -> vector<1x128xf32>
    %cst_27 = arith.constant 0.001953125 : f32
    %29 = vector.broadcast %cst_27 : f32 to vector<1x128xf32>
    %30 = arith.mulf %28, %29 : vector<1x128xf32>
    %31 = arith.mulf %26, %26 : vector<1x128xf32>
    %32 = arith.subf %30, %31 : vector<1x128xf32>
    %c0_28 = arith.constant 0 : index
    %c0_29 = arith.constant 0 : index
    %33 = vector.load %arg4[%c0_28, %c0_29] : memref<2x128xf32, #tpu.memory_space<vmem>>, vector<2x128xf32>
    %34 = vector.extract_strided_slice %33 {offsets = [0, 0], sizes = [1, 128], strides = [1, 1]} : vector<2x128xf32> to vector<1x128xf32>
    %cst_30 = arith.constant 9.99999974E-6 : f32
    %35 = vector.broadcast %cst_30 : f32 to vector<1x128xf32>
    %36 = arith.addf %32, %35 : vector<1x128xf32>
    %37 = math.rsqrt %36 : vector<1x128xf32>
    %38 = arith.mulf %34, %37 : vector<1x128xf32>
    %39 = vector.extract_strided_slice %33 {offsets = [1, 0], sizes = [1, 128], strides = [1, 1]} : vector<2x128xf32> to vector<1x128xf32>
    %40 = arith.mulf %26, %38 : vector<1x128xf32>
    %41 = arith.subf %39, %40 : vector<1x128xf32>
    %42 = vector.broadcast %38 : vector<1x128xf32> to vector<16x128xf32>
    %43 = arith.mulf %17, %42 : vector<16x128xf32>
    %44 = vector.broadcast %41 : vector<1x128xf32> to vector<16x128xf32>
    %45 = arith.addf %43, %44 : vector<16x128xf32>
    %c0_31 = arith.constant 0 : index
    %c0_32 = arith.constant 0 : index
    %46 = vector.load %arg5[%c0_31, %c0_32] : memref<8x16xf32, #tpu.memory_space<vmem>>, vector<8x16xf32>
    %cst_33 = arith.constant dense<0.000000e+00> : vector<8x128xf32>
    %47 = tpu.matmul %46, %45, %cst_33 {dimension_numbers = #tpu.dot_dimension_numbers<[1], [0], [0], [1], [0, 0, 1, 1], [], []>} : vector<8x16xf32>, vector<16x128xf32>, vector<8x128xf32> -> vector<8x128xf32>
    %c0_34 = arith.constant 0 : index
    %c0_35 = arith.constant 0 : index
    %48 = vector.load %arg6[%c0_34, %c0_35] : memref<128x64xf32, #tpu.memory_space<vmem>>, vector<128x64xf32>
    %cst_36 = arith.constant dense<0.000000e+00> : vector<8x64xf32>
    %49 = tpu.matmul %47, %48, %cst_36 {dimension_numbers = #tpu.dot_dimension_numbers<[1], [0], [0], [1], [0, 0, 1, 1], [], []>} : vector<8x128xf32>, vector<128x64xf32>, vector<8x64xf32> -> vector<8x64xf32>
    %c1_37 = arith.constant 1 : index
    %c0_38 = arith.constant 0 : index
    %c0_39 = arith.constant 0 : index
    %50 = vector.load %arg7[%c1_37, %c0_38, %c0_39] : memref<3x64x64xf32, #tpu.memory_space<vmem>>, vector<1x64x64xf32>
    %51 = vector.shape_cast %50 : vector<1x64x64xf32> to vector<64x64xf32>
    %cst_40 = arith.constant dense<0.000000e+00> : vector<8x64xf32>
    %52 = tpu.matmul %49, %51, %cst_40 {dimension_numbers = #tpu.dot_dimension_numbers<[1], [0], [0], [1], [0, 0, 1, 1], [], []>} : vector<8x64xf32>, vector<64x64xf32>, vector<8x64xf32> -> vector<8x64xf32>
    %c0_41 = arith.constant 0 : index
    %c0_42 = arith.constant 0 : index
    %c0_43 = arith.constant 0 : index
    %53 = vector.load %arg8[%c0_41, %c0_42, %c0_43] : memref<2x8x8xf32, #tpu.memory_space<vmem>>, vector<1x8x8xf32>
    %54 = vector.shape_cast %53 : vector<1x8x8xf32> to vector<8x8xf32>
    %cst_44 = arith.constant dense<0.000000e+00> : vector<8x64xf32>
    %55 = tpu.matmul %54, %49, %cst_44 {dimension_numbers = #tpu.dot_dimension_numbers<[1], [0], [0], [1], [0, 0, 1, 1], [], []>} : vector<8x8xf32>, vector<8x64xf32>, vector<8x64xf32> -> vector<8x64xf32>
    %c1_45 = arith.constant 1 : index
    %c0_46 = arith.constant 0 : index
    %c0_47 = arith.constant 0 : index
    %56 = vector.load %arg8[%c1_45, %c0_46, %c0_47] : memref<2x8x8xf32, #tpu.memory_space<vmem>>, vector<1x8x8xf32>
    %57 = vector.shape_cast %56 : vector<1x8x8xf32> to vector<8x8xf32>
    %cst_48 = arith.constant dense<0.000000e+00> : vector<8x64xf32>
    %58 = tpu.matmul %57, %49, %cst_48 {dimension_numbers = #tpu.dot_dimension_numbers<[1], [0], [0], [1], [0, 0, 1, 1], [], []>} : vector<8x8xf32>, vector<8x64xf32>, vector<8x64xf32> -> vector<8x64xf32>
    %c0_49 = arith.constant 0 : index
    %c0_50 = arith.constant 0 : index
    %c0_51 = arith.constant 0 : index
    %59 = vector.load %arg7[%c0_49, %c0_50, %c0_51] : memref<3x64x64xf32, #tpu.memory_space<vmem>>, vector<1x64x64xf32>
    %60 = vector.shape_cast %59 : vector<1x64x64xf32> to vector<64x64xf32>
    %cst_52 = arith.constant dense<0.000000e+00> : vector<8x64xf32>
    %61 = tpu.matmul %55, %60, %cst_52 {dimension_numbers = #tpu.dot_dimension_numbers<[1], [0], [0], [1], [0, 0, 1, 1], [], []>} : vector<8x64xf32>, vector<64x64xf32>, vector<8x64xf32> -> vector<8x64xf32>
    %62 = arith.addf %52, %61 : vector<8x64xf32>
    %c2_53 = arith.constant 2 : index
    %c0_54 = arith.constant 0 : index
    %c0_55 = arith.constant 0 : index
    %63 = vector.load %arg7[%c2_53, %c0_54, %c0_55] : memref<3x64x64xf32, #tpu.memory_space<vmem>>, vector<1x64x64xf32>
    %64 = vector.shape_cast %63 : vector<1x64x64xf32> to vector<64x64xf32>
    %cst_56 = arith.constant dense<0.000000e+00> : vector<8x64xf32>
    %65 = tpu.matmul %58, %64, %cst_56 {dimension_numbers = #tpu.dot_dimension_numbers<[1], [0], [0], [1], [0, 0, 1, 1], [], []>} : vector<8x64xf32>, vector<64x64xf32>, vector<8x64xf32> -> vector<8x64xf32>
    %66 = arith.addf %62, %65 : vector<8x64xf32>
    %cst_57 = arith.constant dense<0.000000e+00> : vector<64xf32>
    %67 = vector.multi_reduction <add>, %66, %cst_57 [0] : vector<8x64xf32> to vector<64xf32>
    %68 = vector.shape_cast %67 : vector<64xf32> to vector<1x64xf32>
    %69 = arith.mulf %66, %66 : vector<8x64xf32>
    %cst_58 = arith.constant dense<0.000000e+00> : vector<64xf32>
    %70 = vector.multi_reduction <add>, %69, %cst_58 [0] : vector<8x64xf32> to vector<64xf32>
    %71 = vector.shape_cast %70 : vector<64xf32> to vector<1x64xf32>
    %c0_59 = arith.constant 0 : index
    %c0_60 = arith.constant 0 : index
    %72 = vector.load %arg9[%c0_59, %c0_60] : memref<64x64xf32, #tpu.memory_space<vmem>>, vector<64x64xf32>
    %cst_61 = arith.constant dense<0.000000e+00> : vector<1x64xf32>
    %73 = tpu.matmul %68, %72, %cst_61 {dimension_numbers = #tpu.dot_dimension_numbers<[1], [0], [0], [1], [0, 0, 1, 1], [], []>} : vector<1x64xf32>, vector<64x64xf32>, vector<1x64xf32> -> vector<1x64xf32>
    %cst_62 = arith.constant 7.812500e-03 : f32
    %74 = vector.broadcast %cst_62 : f32 to vector<1x64xf32>
    %75 = arith.mulf %73, %74 : vector<1x64xf32>
    %c0_63 = arith.constant 0 : index
    %c0_64 = arith.constant 0 : index
    %76 = vector.load %arg9[%c0_63, %c0_64] : memref<64x64xf32, #tpu.memory_space<vmem>>, vector<64x64xf32>
    %cst_65 = arith.constant dense<0.000000e+00> : vector<1x64xf32>
    %77 = tpu.matmul %71, %76, %cst_65 {dimension_numbers = #tpu.dot_dimension_numbers<[1], [0], [0], [1], [0, 0, 1, 1], [], []>} : vector<1x64xf32>, vector<64x64xf32>, vector<1x64xf32> -> vector<1x64xf32>
    %cst_66 = arith.constant 7.812500e-03 : f32
    %78 = vector.broadcast %cst_66 : f32 to vector<1x64xf32>
    %79 = arith.mulf %77, %78 : vector<1x64xf32>
    %80 = arith.mulf %75, %75 : vector<1x64xf32>
    %81 = arith.subf %79, %80 : vector<1x64xf32>
    %c0_67 = arith.constant 0 : index
    %c0_68 = arith.constant 0 : index
    %82 = vector.load %arg10[%c0_67, %c0_68] : memref<2x64xf32, #tpu.memory_space<vmem>>, vector<2x64xf32>
    %83 = vector.extract_strided_slice %82 {offsets = [0, 0], sizes = [1, 64], strides = [1, 1]} : vector<2x64xf32> to vector<1x64xf32>
    %cst_69 = arith.constant 9.99999974E-6 : f32
    %84 = vector.broadcast %cst_69 : f32 to vector<1x64xf32>
    %85 = arith.addf %81, %84 : vector<1x64xf32>
    %86 = math.rsqrt %85 : vector<1x64xf32>
    %87 = arith.mulf %83, %86 : vector<1x64xf32>
    %88 = vector.extract_strided_slice %82 {offsets = [1, 0], sizes = [1, 64], strides = [1, 1]} : vector<2x64xf32> to vector<1x64xf32>
    %89 = arith.mulf %75, %87 : vector<1x64xf32>
    %90 = arith.subf %88, %89 : vector<1x64xf32>
    %91 = vector.broadcast %87 : vector<1x64xf32> to vector<8x64xf32>
    %92 = arith.mulf %66, %91 : vector<8x64xf32>
    %93 = vector.broadcast %90 : vector<1x64xf32> to vector<8x64xf32>
    %94 = arith.addf %92, %93 : vector<8x64xf32>
    %c0_70 = arith.constant 0 : index
    %c0_71 = arith.constant 0 : index
    %95 = vector.load %arg11[%c0_70, %c0_71] : memref<4x8xf32, #tpu.memory_space<vmem>>, vector<4x8xf32>
    %cst_72 = arith.constant dense<0.000000e+00> : vector<4x64xf32>
    %96 = tpu.matmul %95, %94, %cst_72 {dimension_numbers = #tpu.dot_dimension_numbers<[1], [0], [0], [1], [0, 0, 1, 1], [], []>} : vector<4x8xf32>, vector<8x64xf32>, vector<4x64xf32> -> vector<4x64xf32>
    %c0_73 = arith.constant 0 : index
    %c0_74 = arith.constant 0 : index
    %97 = vector.load %arg12[%c0_73, %c0_74] : memref<64x32xf32, #tpu.memory_space<vmem>>, vector<64x32xf32>
    %cst_75 = arith.constant dense<0.000000e+00> : vector<4x32xf32>
    %98 = tpu.matmul %96, %97, %cst_75 {dimension_numbers = #tpu.dot_dimension_numbers<[1], [0], [0], [1], [0, 0, 1, 1], [], []>} : vector<4x64xf32>, vector<64x32xf32>, vector<4x32xf32> -> vector<4x32xf32>
    %c0_76 = arith.constant 0 : index
    %c0_77 = arith.constant 0 : index
    %99 = vector.load %arg15[%c0_76, %c0_77] : memref<1x32xf32, #tpu.memory_space<vmem>>, vector<1x32xf32>
    %c1_78 = arith.constant 1 : index
    %c0_79 = arith.constant 0 : index
    %c0_80 = arith.constant 0 : index
    %100 = vector.load %arg13[%c1_78, %c0_79, %c0_80] : memref<3x32x32xf32, #tpu.memory_space<vmem>>, vector<1x32x32xf32>
    %101 = vector.shape_cast %100 : vector<1x32x32xf32> to vector<32x32xf32>
    %cst_81 = arith.constant dense<0.000000e+00> : vector<4x32xf32>
    %102 = tpu.matmul %98, %101, %cst_81 {dimension_numbers = #tpu.dot_dimension_numbers<[1], [0], [0], [1], [0, 0, 1, 1], [], []>} : vector<4x32xf32>, vector<32x32xf32>, vector<4x32xf32> -> vector<4x32xf32>
    %c0_82 = arith.constant 0 : index
    %c0_83 = arith.constant 0 : index
    %c0_84 = arith.constant 0 : index
    %103 = vector.load %arg14[%c0_82, %c0_83, %c0_84] : memref<2x4x4xf32, #tpu.memory_space<vmem>>, vector<1x4x4xf32>
    %104 = vector.shape_cast %103 : vector<1x4x4xf32> to vector<4x4xf32>
    %cst_85 = arith.constant dense<0.000000e+00> : vector<4x32xf32>
    %105 = tpu.matmul %104, %98, %cst_85 {dimension_numbers = #tpu.dot_dimension_numbers<[1], [0], [0], [1], [0, 0, 1, 1], [], []>} : vector<4x4xf32>, vector<4x32xf32>, vector<4x32xf32> -> vector<4x32xf32>
    %c1_86 = arith.constant 1 : index
    %c0_87 = arith.constant 0 : index
    %c0_88 = arith.constant 0 : index
    %106 = vector.load %arg14[%c1_86, %c0_87, %c0_88] : memref<2x4x4xf32, #tpu.memory_space<vmem>>, vector<1x4x4xf32>
    %107 = vector.shape_cast %106 : vector<1x4x4xf32> to vector<4x4xf32>
    %cst_89 = arith.constant dense<0.000000e+00> : vector<4x32xf32>
    %108 = tpu.matmul %107, %98, %cst_89 {dimension_numbers = #tpu.dot_dimension_numbers<[1], [0], [0], [1], [0, 0, 1, 1], [], []>} : vector<4x4xf32>, vector<4x32xf32>, vector<4x32xf32> -> vector<4x32xf32>
    %c0_90 = arith.constant 0 : index
    %c0_91 = arith.constant 0 : index
    %c0_92 = arith.constant 0 : index
    %109 = vector.load %arg13[%c0_90, %c0_91, %c0_92] : memref<3x32x32xf32, #tpu.memory_space<vmem>>, vector<1x32x32xf32>
    %110 = vector.shape_cast %109 : vector<1x32x32xf32> to vector<32x32xf32>
    %cst_93 = arith.constant dense<0.000000e+00> : vector<4x32xf32>
    %111 = tpu.matmul %105, %110, %cst_93 {dimension_numbers = #tpu.dot_dimension_numbers<[1], [0], [0], [1], [0, 0, 1, 1], [], []>} : vector<4x32xf32>, vector<32x32xf32>, vector<4x32xf32> -> vector<4x32xf32>
    %112 = arith.addf %102, %111 : vector<4x32xf32>
    %c2_94 = arith.constant 2 : index
    %c0_95 = arith.constant 0 : index
    %c0_96 = arith.constant 0 : index
    %113 = vector.load %arg13[%c2_94, %c0_95, %c0_96] : memref<3x32x32xf32, #tpu.memory_space<vmem>>, vector<1x32x32xf32>
    %114 = vector.shape_cast %113 : vector<1x32x32xf32> to vector<32x32xf32>
    %cst_97 = arith.constant dense<0.000000e+00> : vector<4x32xf32>
    %115 = tpu.matmul %108, %114, %cst_97 {dimension_numbers = #tpu.dot_dimension_numbers<[1], [0], [0], [1], [0, 0, 1, 1], [], []>} : vector<4x32xf32>, vector<32x32xf32>, vector<4x32xf32> -> vector<4x32xf32>
    %116 = arith.addf %112, %115 : vector<4x32xf32>
    %117 = vector.broadcast %99 : vector<1x32xf32> to vector<4x32xf32>
    %118 = arith.addf %116, %117 : vector<4x32xf32>
    %cst_98 = arith.constant dense<0.000000e+00> : vector<32xf32>
    %119 = vector.multi_reduction <add>, %118, %cst_98 [0] : vector<4x32xf32> to vector<32xf32>
    %120 = vector.shape_cast %119 : vector<32xf32> to vector<1x32xf32>
    %121 = arith.mulf %118, %118 : vector<4x32xf32>
    %cst_99 = arith.constant dense<0.000000e+00> : vector<32xf32>
    %122 = vector.multi_reduction <add>, %121, %cst_99 [0] : vector<4x32xf32> to vector<32xf32>
    %123 = vector.shape_cast %122 : vector<32xf32> to vector<1x32xf32>
    %c0_100 = arith.constant 0 : index
    %c0_101 = arith.constant 0 : index
    %124 = vector.load %arg16[%c0_100, %c0_101] : memref<32x32xf32, #tpu.memory_space<vmem>>, vector<32x32xf32>
    %cst_102 = arith.constant dense<0.000000e+00> : vector<1x32xf32>
    %125 = tpu.matmul %120, %124, %cst_102 {dimension_numbers = #tpu.dot_dimension_numbers<[1], [0], [0], [1], [0, 0, 1, 1], [], []>} : vector<1x32xf32>, vector<32x32xf32>, vector<1x32xf32> -> vector<1x32xf32>
    %cst_103 = arith.constant 3.125000e-02 : f32
    %126 = vector.broadcast %cst_103 : f32 to vector<1x32xf32>
    %127 = arith.mulf %125, %126 : vector<1x32xf32>
    %c0_104 = arith.constant 0 : index
    %c0_105 = arith.constant 0 : index
    %128 = vector.load %arg16[%c0_104, %c0_105] : memref<32x32xf32, #tpu.memory_space<vmem>>, vector<32x32xf32>
    %cst_106 = arith.constant dense<0.000000e+00> : vector<1x32xf32>
    %129 = tpu.matmul %123, %128, %cst_106 {dimension_numbers = #tpu.dot_dimension_numbers<[1], [0], [0], [1], [0, 0, 1, 1], [], []>} : vector<1x32xf32>, vector<32x32xf32>, vector<1x32xf32> -> vector<1x32xf32>
    %cst_107 = arith.constant 3.125000e-02 : f32
    %130 = vector.broadcast %cst_107 : f32 to vector<1x32xf32>
    %131 = arith.mulf %129, %130 : vector<1x32xf32>
    %132 = arith.mulf %127, %127 : vector<1x32xf32>
    %133 = arith.subf %131, %132 : vector<1x32xf32>
    %c0_108 = arith.constant 0 : index
    %c0_109 = arith.constant 0 : index
    %134 = vector.load %arg17[%c0_108, %c0_109] : memref<2x32xf32, #tpu.memory_space<vmem>>, vector<2x32xf32>
    %135 = vector.extract_strided_slice %134 {offsets = [0, 0], sizes = [1, 32], strides = [1, 1]} : vector<2x32xf32> to vector<1x32xf32>
    %cst_110 = arith.constant 9.99999974E-6 : f32
    %136 = vector.broadcast %cst_110 : f32 to vector<1x32xf32>
    %137 = arith.addf %133, %136 : vector<1x32xf32>
    %138 = math.rsqrt %137 : vector<1x32xf32>
    %139 = arith.mulf %135, %138 : vector<1x32xf32>
    %140 = vector.extract_strided_slice %134 {offsets = [1, 0], sizes = [1, 32], strides = [1, 1]} : vector<2x32xf32> to vector<1x32xf32>
    %141 = arith.mulf %127, %139 : vector<1x32xf32>
    %142 = arith.subf %140, %141 : vector<1x32xf32>
    %143 = vector.broadcast %139 : vector<1x32xf32> to vector<4x32xf32>
    %144 = arith.mulf %118, %143 : vector<4x32xf32>
    %145 = vector.broadcast %142 : vector<1x32xf32> to vector<4x32xf32>
    %146 = arith.addf %144, %145 : vector<4x32xf32>
    %c0_111 = arith.constant 0 : index
    %c0_112 = arith.constant 0 : index
    %147 = vector.load %arg18[%c0_111, %c0_112] : memref<16x4xf32, #tpu.memory_space<vmem>>, vector<16x4xf32>
    %cst_113 = arith.constant dense<0.000000e+00> : vector<16x32xf32>
    %148 = tpu.matmul %147, %146, %cst_113 {dimension_numbers = #tpu.dot_dimension_numbers<[1], [0], [0], [1], [0, 0, 1, 1], [], []>} : vector<16x4xf32>, vector<4x32xf32>, vector<16x32xf32> -> vector<16x32xf32>
    %c0_114 = arith.constant 0 : index
    %c0_115 = arith.constant 0 : index
    %149 = vector.load %arg19[%c0_114, %c0_115] : memref<32x128xf32, #tpu.memory_space<vmem>>, vector<32x128xf32>
    %cst_116 = arith.constant dense<0.000000e+00> : vector<16x128xf32>
    %150 = tpu.matmul %148, %149, %cst_116 {dimension_numbers = #tpu.dot_dimension_numbers<[1], [0], [0], [1], [0, 0, 1, 1], [], []>} : vector<16x32xf32>, vector<32x128xf32>, vector<16x128xf32> -> vector<16x128xf32>
    %c0_117 = arith.constant 0 : index
    %c0_118 = arith.constant 0 : index
    %151 = vector.load %arg20[%c0_117, %c0_118] : memref<16x128xf32, #tpu.memory_space<vmem>>, vector<16x128xf32>
    tpu.vector_store %arg20[%c0_117, %c0_118], %150 {strides = array<i32>} : memref<16x128xf32, #tpu.memory_space<vmem>>, vector<16x128xf32>,
    return
  }
}

</mosaic_0001>

<bundles_post_ra>
// kernel: attention_pathway_forward.1
= control target key start
LH: loop header
LB: loop body
LE: loop exit
PB: predicated region body
PF: predicated region fallthrough
CT: control target
= control target key end

     0   :  { %vm86_vm0 = vcmask 130048   ;;  %v3425_v34 = vmov 0.0|0.0   ;;  %vm3426_vm1 = vmmov 0   ;;  %vm879_vm2 = vcmask 64512   ;;  %s4189_s0 = inlined_call_operand.vmem [shape: f32[16,128], index: 0, kind: input, shape index: {}]   ;;  %s4190_s2 = inlined_call_operand.vmem [shape: f32[2,16,16], index: 2, kind: input, shape index: {}]   ;;  %s4191_s1 = inlined_call_operand.vmem [shape: f32[3,128,128], index: 1, kind: input, shape index: {}]   ;;  %s4192_s3 = inlined_call_operand.vmem [shape: f32[128,128], index: 3, kind: input, shape index: {}]   ;;  %s4193_s4 = inlined_call_operand.vmem [shape: f32[2,128], index: 4, kind: input, shape index: {}]   ;;  %s4194_s6 = inlined_call_operand.vmem [shape: f32[128,64], index: 6, kind: input, shape index: {}]   ;;  %s4195_s5 = inlined_call_operand.vmem [shape: f32[8,16], index: 5, kind: input, shape index: {}]   ;;  %s4196_s7 = inlined_call_operand.vmem [shape: f32[3,64,64], index: 7, kind: input, shape index: {}]   ;;  %s4197_s8 = inlined_call_operand.vmem [shape: f32[2,8,8], index: 8, kind: input, shape index: {}]   ;;  %s4198_s9 = inlined_call_operand.vmem [shape: f32[64,64], index: 9, kind: input, shape index: {}]   ;;  %s4199_s10 = inlined_call_operand.vmem [shape: f32[2,64], index: 10, kind: input, shape index: {}]   ;;  %s4200_s12 = inlined_call_operand.vmem [shape: f32[64,32], index: 12, kind: input, shape index: {}]   ;;  %s4201_s11 = inlined_call_operand.vmem [shape: f32[4,8], index: 11, kind: input, shape index: {}]   ;;  %s4202_s13 = inlined_call_operand.vmem [shape: f32[3,32,32], index: 13, kind: input, shape index: {}]   ;;  %s4203_s14 = inlined_call_operand.vmem [shape: f32[2,4,4], index: 14, kind: input, shape index: {}]   ;;  %s4204_s16 = inlined_call_operand.vmem [shape: f32[32,32], index: 16, kind: input, shape index: {}]   ;;  %s4205_s15 = inlined_call_operand.vmem [shape: f32[1,32], index: 15, kind: input, shape index: {}]   ;;  %s4206_s18 = inlined_call_operand.vmem [shape: f32[16,4], index: 18, kind: input, shape index: {}]   ;;  %s4207_s17 = inlined_call_operand.vmem [shape: f32[2,32], index: 17, kind: input, shape index: {}]   ;;  %s4208_s19 = inlined_call_operand.vmem [shape: f32[32,128], index: 19, kind: input, shape index: {}]   ;;  %s4209_s20 = inlined_call_operand.vmem [shape: f32[16,128], index: 20, kind: output, shape index: {}]  }
   0x1   :  { %4214 = sst [smem:[#allocation2_spill]] %s4189_s0  ;;  %vm1036_vm3 = vcmask 523264   ;;  %vm1624_vm4 = vcmask 1043456   ;;  %vm1620_vm5 = vcmask 31744   ;;  %vm1777_vm6 = vcmask 261120  }
   0x2   :  { %4215 = sst [smem:[#allocation3_spill]] %s4190_s2  ;;  %s4219_s23 = sld [smem:[#allocation2_spill]]  ;;  %vm2009_vm7 = vcmask 257024  }
   0x3   :  { %4216 = sst [smem:[#allocation4_spill]] %s4191_s1  ;;  %s4220_s26 = sld [smem:[#allocation3_spill]] }
   0x4   :  { %4217 = sst [smem:[#allocation5_spill]] %s4192_s3  ;;  %s4221_s30 = sld [smem:[#allocation4_spill]] }
   0x5   :  { %4218 = sst [smem:[#allocation6_spill]] %s4193_s4  ;;  %s4222_s29 = sld [smem:[#allocation5_spill]] }
   0x6   :  { %s4223_s4 = sld [smem:[#allocation6_spill]] }
   0x8   :  { %v3536_v0 = vld [vmem:[%s4219_s23] sm:$0xff]  ;;  %v3541_v1 = vld [vmem:[%s4219_s23 + $0x8] sm:$0xff] }
   0x9   :  { %v84_v2 = vld [vmem:[%s4220_s26] sm:$0xff]  ;;  %v3119_v3 = vpack.c.bf16 %v3541_v1, %v3536_v0  ;;  %v2393_v4 = vld [vmem:[%s4220_s26 + $0x10] sm:$0xff]  ;;  %v85_v10 = vld [vmem:[%s4220_s26 + $0x8] sm:$0xff] }
   0xa   :  { %2682 = vmatprep.mubr.msk.f32.mxu0 %vm86_vm0, %v84_v2  ;;  %2689 = vmatprep.mubr.msk.f32.mxu1 %vm86_vm0, %v2393_v4  ;;  %v252_v5 = vld [vmem:[%s4221_s30] sm:$0xff]  ;;  %v253_v6 = vld [vmem:[%s4221_s30 + $0x8] sm:$0xff]  ;;  %v254_v7 = vld [vmem:[%s4221_s30 + $0x10] sm:$0xff] }
   0xb   :  { %3120 = vmatprep.subr.bf16.mxu0 %v3119_v3  ;;  %3124 = vmatprep.subr.bf16.mxu1 %v3119_v3  ;;  %v3127_v8 = vpack.c.bf16 %v253_v6, %v252_v5  ;;  %v255_v9 = vld [vmem:[%s4221_s30 + $0x18] sm:$0xff]  ;;  %v256_v13 = vld [vmem:[%s4221_s30 + $0x20] sm:$0xff]  ;;  %v257_v14 = vld [vmem:[%s4221_s30 + $0x28] sm:$0xff] }
   0xc   :  { %3122 = vmatpush3.bf16.msra.mxu0 %v3119_v3  ;;  %3126 = vmatpush3.bf16.msra.mxu1 %v3119_v3  ;;  %v2394_v11 = vld [vmem:[%s4220_s26 + $0x18] sm:$0xff]  ;;  %v3131_v12 = vpack.c.bf16 %v255_v9, %v254_v7  ;;  %v3135_v15 = vpack.c.bf16 %v257_v14, %v256_v13  ;;  %v258_v16 = vld [vmem:[%s4221_s30 + $0x30] sm:$0xff]  ;;  %v260_v19 = vld [vmem:[%s4221_s30 + $0x40] sm:$0xff] }
   0xd   :  { %3128 = vmatprep.subr.bf16.mxu0 %v3127_v8  ;;  %v259_v17 = vld [vmem:[%s4221_s30 + $0x38] sm:$0xff]  ;;  %v261_v20 = vld [vmem:[%s4221_s30 + $0x48] sm:$0xff]  ;;  %v262_v22 = vld [vmem:[%s4221_s30 + $0x50] sm:$0xff]  ;;  %3223 = vmatprep.subr.bf16.mxu1 %v3425_v34 }
   0xe   :  { %v3139_v18 = vpack.c.bf16 %v259_v17, %v258_v16  ;;  %v3143_v21 = vpack.c.bf16 %v261_v20, %v260_v19  ;;  %v263_v23 = vld [vmem:[%s4221_s30 + $0x58] sm:$0xff]  ;;  %v264_v25 = vld [vmem:[%s4221_s30 + $0x60] sm:$0xff]  ;;  %v265_v26 = vld [vmem:[%s4221_s30 + $0x68] sm:$0xff] }
   0xf   :  { %2683 = vmatmul.mubr.msk.f32.vlgmr.msra.gmra.mrb[0].mxu0 %vm86_vm0, %v85_v10  ;;  %2690 = vmatmul.mubr.msk.f32.vlgmr.msra.gmra.mrb[0].mxu1 %vm86_vm0, %v2394_v11  ;;  %v3147_v24 = vpack.c.bf16 %v263_v23, %v262_v22  ;;  %v3151_v27 = vpack.c.bf16 %v265_v26, %v264_v25  ;;  %v266_v28 = vld [vmem:[%s4221_s30 + $0x70] sm:$0xff]  ;;  %v267_v29 = vld [vmem:[%s4221_s30 + $0x78] sm:$0xff]  ;;  %v2375_v31 = vld [vmem:[%s4221_s30 + $0x80] sm:$0xff] }
  0x10   :  { %3130 = vmatpush3.bf16.msra.mxu0 %v3127_v8  ;;  %v3155_v30 = vpack.c.bf16 %v267_v29, %v266_v28  ;;  %v2376_v32 = vld [vmem:[%s4221_s30 + $0x88] sm:$0xff]  ;;  %v528_v35 = vld [vmem:[%s4222_s29] sm:$0xff]  ;;  %v530_v37 = vld [vmem:[%s4222_s29 + $0x10] sm:$0xff] }
  0x11   :  { %3132 = vmatprep.subr.bf16.mxu0 %v3131_v12  ;;  %v3159_v33 = vpack.c.bf16 %v2376_v32, %v2375_v31  ;;  %v529_v36 = vld [vmem:[%s4222_s29 + $0x8] sm:$0xff]  ;;  %v531_v39 = vld [vmem:[%s4222_s29 + $0x18] sm:$0xff]  ;;  %v532_v41 = vld [vmem:[%s4222_s29 + $0x20] sm:$0xff] }
  0x12   :  { %v3625_v38 = vpack.c.bf16 %v529_v36, %v528_v35  ;;  %v3631_v40 = vpack.c.bf16 %v531_v39, %v530_v37  ;;  %v533_v42 = vld [vmem:[%s4222_s29 + $0x28] sm:$0xff]  ;;  %v534_v44 = vld [vmem:[%s4222_s29 + $0x30] sm:$0xff]  ;;  %v535_v45 = vld [vmem:[%s4222_s29 + $0x38] sm:$0xff] }
  0x13   :  { %v3641_v43 = vpack.c.bf16 %v533_v42, %v532_v41  ;;  %v3651_v46 = vpack.c.bf16 %v535_v45, %v534_v44  ;;  %v2377_v47 = vld [vmem:[%s4221_s30 + $0x90] sm:$0xff]  ;;  %v2378_v48 = vld [vmem:[%s4221_s30 + $0x98] sm:$0xff]  ;;  %v2379_v54 = vld [vmem:[%s4221_s30 + $0xa0] sm:$0xff] }
  0x14   :  { %3134 = vmatpush3.bf16.msra.mxu0 %v3131_v12  ;;  %3225 = vmatpush3.bf16.msra.mxu1 %v3625_v38  ;;  %v3163_v52 = vpack.c.bf16 %v2378_v48, %v2377_v47  ;;  %v2380_v55 = vld [vmem:[%s4221_s30 + $0xa8] sm:$0xff]  ;;  %v2381_v57 = vld [vmem:[%s4221_s30 + $0xb0] sm:$0xff]  ;;  %v2382_v58 = vld [vmem:[%s4221_s30 + $0xb8] sm:$0xff] }
  0x15   :  { %3136 = vmatprep.subr.bf16.mxu0 %v3135_v15  ;;  %3226 = vmatprep.subr.bf16.mxu1 %v3425_v34  ;;  %v3167_v56 = vpack.c.bf16 %v2380_v55, %v2379_v54  ;;  %v3171_v59 = vpack.c.bf16 %v2382_v58, %v2381_v57  ;;  %v2383_v60 = vld [vmem:[%s4221_s30 + $0xc0] sm:$0xff]  ;;  %v2384_v61 = vld [vmem:[%s4221_s30 + $0xc8] sm:$0xff]  ;;  %v2385_v63 = vld [vmem:[%s4221_s30 + $0xd0] sm:$0xff] }
  0x16   :  { %v3175_v62 = vpack.c.bf16 %v2384_v61, %v2383_v60  ;;  %v2387_v3 = vld [vmem:[%s4221_s30 + $0xe0] sm:$0xff]  ;;  %v2388_v4 = vld [vmem:[%s4221_s30 + $0xe8] sm:$0xff]  ;;  %v2389_v6 = vld [vmem:[%s4221_s30 + $0xf0] sm:$0xff] }
  0x17   :  { %v3183_v5 = vpack.c.bf16 %v2388_v4, %v2387_v3  ;;  %v2390_v7 = vld [vmem:[%s4221_s30 + $0xf8] sm:$0xff]  ;;  %v2397_v9 = vld [vmem:[%s4221_s30 + $0x100] sm:$0xff]  ;;  %v2398_v10 = vld [vmem:[%s4221_s30 + $0x108] sm:$0xff] }
  0x18   :  { %3138 = vmatpush3.bf16.msra.mxu0 %v3135_v15  ;;  %3228 = vmatpush3.bf16.msra.mxu1 %v3631_v40  ;;  %v3187_v8 = vpack.c.bf16 %v2390_v7, %v2389_v6  ;;  %v3191_v11 = vpack.c.bf16 %v2398_v10, %v2397_v9  ;;  %v2399_v12 = vld [vmem:[%s4221_s30 + $0x110] sm:$0xff]  ;;  %v2400_v13 = vld [vmem:[%s4221_s30 + $0x118] sm:$0xff]  ;;  %v2401_v15 = vld [vmem:[%s4221_s30 + $0x120] sm:$0xff]  ;;  %v697_v10 = vlaneseq }
  0x19   :  { %3140 = vmatprep.subr.bf16.mxu0 %v3139_v18  ;;  %3229 = vmatprep.subr.bf16.mxu1 %v3425_v34  ;;  %v3195_v14 = vpack.c.bf16 %v2400_v13, %v2399_v12  ;;  %v2402_v16 = vld [vmem:[%s4221_s30 + $0x128] sm:$0xff]  ;;  %v2404_v19 = vld [vmem:[%s4221_s30 + $0x138] sm:$0xff]  ;;  %v2407_v23 = vld [vmem:[%s4221_s30 + $0x150] sm:$0xff] }
  0x1a   :  { %v3199_v17 = vpack.c.bf16 %v2402_v16, %v2401_v15  ;;  %v2409_v26 = vld [vmem:[%s4221_s30 + $0x160] sm:$0xff]  ;;  %v2411_v29 = vld [vmem:[%s4221_s30 + $0x170] sm:$0xff]  ;;  %v539_v37 = vld [vmem:[%s4222_s29 + $0x58] sm:$0xff] }
  0x1b   :  { %v536_v32 = vld [vmem:[%s4222_s29 + $0x40] sm:$0xff]  ;;  %v538_v36 = vld [vmem:[%s4222_s29 + $0x50] sm:$0xff]  ;;  %v541_v42 = vld [vmem:[%s4222_s29 + $0x68] sm:$0xff] }
  0x1c   :  { %3142 = vmatpush3.bf16.msra.mxu0 %v3139_v18  ;;  %3231 = vmatpush3.bf16.msra.mxu1 %v3641_v43  ;;  %v2403_v18 = vld [vmem:[%s4221_s30 + $0x130] sm:$0xff]  ;;  %v3239_v39 = vpack.c.bf16 %v539_v37, %v538_v36  ;;  %v540_v41 = vld [vmem:[%s4222_s29 + $0x60] sm:$0xff]  ;;  %v543_v47 = vld [vmem:[%s4222_s29 + $0x78] sm:$0xff] }
  0x1d   :  { %3144 = vmatprep.subr.bf16.mxu0 %v3143_v21  ;;  %3232 = vmatprep.subr.bf16.mxu1 %v3425_v34  ;;  %v3203_v20 = vpack.c.bf16 %v2404_v19, %v2403_v18  ;;  %v3242_v44 = vpack.c.bf16 %v541_v42, %v540_v41  ;;  %v542_v45 = vld [vmem:[%s4222_s29 + $0x70] sm:$0xff]  ;;  %v688_v12 = vld [vmem:[%s4223_s4] sm:$0x3] }
  0x1e   :  { %v3245_v48 = vpack.c.bf16 %v543_v47, %v542_v45  ;;  %v789_v37 = vld [vmem:[%s4194_s6 + $0x30] sm:$0xff]  ;;  %v791_v42 = vld [vmem:[%s4194_s6 + $0x40] sm:$0xff] }
  0x1f   :  { %v793_v47 = vld [vmem:[%s4194_s6 + $0x50] sm:$0xff] }
  0x20   :  { %3146 = vmatpush3.bf16.msra.mxu0 %v3143_v21  ;;  %3234 = vmatpush3.bf16.msra.mxu1 %v3651_v46  ;;  %v2405_v21 = vld [vmem:[%s4221_s30 + $0x140] sm:$0xff] }
  0x21   :  { %3148 = vmatprep.subr.bf16.mxu0 %v3147_v24  ;;  %3235 = vmatprep.subr.bf16.mxu1 %v3425_v34 }
  0x24   :  { %3150 = vmatpush3.bf16.msra.mxu0 %v3147_v24  ;;  %v2408_v24 = vld [vmem:[%s4221_s30 + $0x158] sm:$0xff] }
  0x25   :  { %3152 = vmatprep.subr.bf16.mxu0 %v3151_v27  ;;  %v3211_v25 = vpack.c.bf16 %v2408_v24, %v2407_v23 }
  0x28   :  { %3154 = vmatpush3.bf16.msra.mxu0 %v3151_v27  ;;  %v2410_v27 = vld [vmem:[%s4221_s30 + $0x168] sm:$0xff] }
  0x29   :  { %3156 = vmatprep.subr.bf16.mxu0 %v3155_v30  ;;  %v3215_v28 = vpack.c.bf16 %v2410_v27, %v2409_v26  ;;  %v784_v26 = vld [vmem:[%s4194_s6 + $0x8] sm:$0xff] }
  0x2c   :  { %3158 = vmatpush3.bf16.msra.mxu0 %v3155_v30  ;;  %v2412_v30 = vld [vmem:[%s4221_s30 + $0x178] sm:$0xff] }
  0x2d   :  { %3160 = vmatprep.subr.bf16.mxu0 %v3159_v33  ;;  %v3219_v31 = vpack.c.bf16 %v2412_v30, %v2411_v29  ;;  %v785_v30 = vld [vmem:[%s4194_s6 + $0x10] sm:$0xff] }
  0xe2   :  { %v2684_v49 = vpop.f32.mrb[0].mxu0  ;;  %v3662_v50 = vpop.f32.mrb[0].mxu1 }
  0xe3   :  { %v159_v51 = vpop.f32.mrb[1].mxu0  ;;  %v243_v53 = vpop.f32.mrb[1].mxu1 }
  0xe4   :  { %2724 = vmatprep.mubr.f32.mxu0 %v159_v51 }
  0xe5   :  { %2725 = vmatmul.mubr.f32.vlgmr.msra.gmra.mrb[2].mxu0 %v2684_v49  ;;  %v3427_v49 = vmov 0.0  }
  0xe6   :  { %3162 = vmatpush3.bf16.msra.mxu0 %v3159_v33  ;;  %2759 = vmatprep.mubr.f32.mxu0 %v3536_v0  ;;  %v2386_v0 = vld [vmem:[%s4221_s30 + $0xd8] sm:$0xff]  ;;  %v537_v33 = vld [vmem:[%s4222_s29 + $0x48] sm:$0xff] }
  0xe7   :  { %3164 = vmatprep.subr.bf16.mxu0 %v3163_v52  ;;  %v3179_v2 = vpack.c.bf16 %v2386_v0, %v2385_v63  ;;  %v3236_v35 = vpack.c.bf16 %v537_v33, %v536_v32  ;;  %2829 = vmatprep.mubr.msk.f32.mxu1 %vm3426_vm1, %v3427_v49  ;;  %v787_v33 = vld [vmem:[%s4194_s6 + $0x20] sm:$0xff] }
  0xe9   :  { %3237 = vmatpush3.bf16.msra.mxu1 %v3236_v35 }
  0xea   :  { %3166 = vmatpush3.bf16.msra.mxu0 %v3163_v52  ;;  %3238 = vmatprep.subr.bf16.mxu1 %v3425_v34 }
  0xeb   :  { %3168 = vmatprep.subr.bf16.mxu0 %v3167_v56 }
  0xed   :  { %3240 = vmatpush3.bf16.msra.mxu1 %v3239_v39 }
  0xee   :  { %3170 = vmatpush3.bf16.msra.mxu0 %v3167_v56  ;;  %3241 = vmatprep.subr.bf16.mxu1 %v3425_v34 }
  0xef   :  { %3172 = vmatprep.subr.bf16.mxu0 %v3171_v59 }
  0xf1   :  { %3243 = vmatpush3.bf16.msra.mxu1 %v3242_v44 }
  0xf2   :  { %3174 = vmatpush3.bf16.msra.mxu0 %v3171_v59  ;;  %3244 = vmatprep.subr.bf16.mxu1 %v3425_v34 }
  0xf3   :  { %3176 = vmatprep.subr.bf16.mxu0 %v3175_v62 }
  0xf5   :  { %3246 = vmatpush3.bf16.msra.mxu1 %v3245_v48 }
  0xf6   :  { %3178 = vmatpush3.bf16.msra.mxu0 %v3175_v62  ;;  %3247 = vmatprep.subr.bf16.mxu1 %v3425_v34 }
  0xf7   :  { %3180 = vmatprep.subr.bf16.mxu0 %v3179_v2 }
  0xfa   :  { %3182 = vmatpush3.bf16.msra.mxu0 %v3179_v2 }
  0xfb   :  { %3184 = vmatprep.subr.bf16.mxu0 %v3183_v5 }
  0xfe   :  { %3186 = vmatpush3.bf16.msra.mxu0 %v3183_v5 }
  0xff   :  { %3188 = vmatprep.subr.bf16.mxu0 %v3187_v8 }
 0x102   :  { %3190 = vmatpush3.bf16.msra.mxu0 %v3187_v8 }
 0x103   :  { %3192 = vmatprep.subr.bf16.mxu0 %v3191_v11 }
 0x105   :  { %2760 = vmatmul.mubr.f32.vlgmr.msra.gmra.mrb[2].mxu0 %v3541_v1  ;;  %v2406_v1 = vld [vmem:[%s4221_s30 + $0x148] sm:$0xff] }
 0x106   :  { %3194 = vmatpush3.bf16.msra.mxu0 %v3191_v11  ;;  %2794 = vmatprep.mubr.f32.mxu0 %v243_v53  ;;  %v3207_v22 = vpack.c.bf16 %v2406_v1, %v2405_v21  ;;  %v698_v11 = vshrl.u32 %v697_v10, 7 }
 0x107   :  { %3196 = vmatprep.subr.bf16.mxu0 %v3195_v14 }
 0x108   :  { %v3803_v13 = vsub.s32 0, %v698_v11  ;;  %v3806_v21 = vsub.s32 1, %v698_v11  ;;  %v2414_v11 = vld [vmem:[%s4196_s7 + $0x40] sm:$0xff] }
 0x10a   :  { %3198 = vmatpush3.bf16.msra.mxu0 %v3195_v14 }
 0x10b   :  { %3200 = vmatprep.subr.bf16.mxu0 %v3199_v17 }
 0x10e   :  { %3202 = vmatpush3.bf16.msra.mxu0 %v3199_v17 }
 0x10f   :  { %3204 = vmatprep.subr.bf16.mxu0 %v3203_v20 }
 0x112   :  { %3206 = vmatpush3.bf16.msra.mxu0 %v3203_v20 }
 0x113   :  { %3208 = vmatprep.subr.bf16.mxu0 %v3207_v22 }
 0x116   :  { %3210 = vmatpush3.bf16.msra.mxu0 %v3207_v22 }
 0x117   :  { %3212 = vmatprep.subr.bf16.mxu0 %v3211_v25 }
 0x11a   :  { %3214 = vmatpush3.bf16.msra.mxu0 %v3211_v25  ;;  %v783_v25 = vld [vmem:[%s4194_s6] sm:$0xff] }
 0x11b   :  { %3216 = vmatprep.subr.bf16.mxu0 %v3215_v28  ;;  %v3275_v29 = vpack.c.bf16 %v784_v26, %v783_v25  ;;  %v2420_v25 = vld [vmem:[%s4196_s7 + $0x70] sm:$0xff]  ;;  %v2421_v26 = vld [vmem:[%s4196_s7 + $0x78] sm:$0xff] }
 0x11e   :  { %3218 = vmatpush3.bf16.msra.mxu0 %v3215_v28  ;;  %v709_v28 = vld [vmem:[%s4195_s5] sm:$0xff] }
 0x11f   :  { %3220 = vmatprep.subr.bf16.mxu0 %v3219_v31 }
 0x122   :  { %3222 = vmatpush3.bf16.msra.mxu0 %v3219_v31  ;;  %v786_v31 = vld [vmem:[%s4194_s6 + $0x18] sm:$0xff] }
 0x123   :  { %2909 = vmatprep.subr.mxu0 %v3427_v49  ;;  %v3278_v32 = vpack.c.bf16 %v786_v31, %v785_v30  ;;  %v2429_v31 = vld [vmem:[%s4196_s7 + $0x90] sm:$0xff] }
 0x125   :  { %2795 = vmatmul.mubr.f32.vlgmr.msra.gmra.mrb[2].mxu0 %v3662_v50 }
 0x126   :  { %2911 = vmatprep.mubr.msk.f32.mxu0 %vm3426_vm1, %v3427_v49 }
 0x1f8   :  { %v2796_v50 = vpop.f32.mrb[2].mxu0 }
 0x1f9   :  { %v520_v51 = vmul.f32 %v2796_v50, %v2796_v50  ;;  %v501_v52 = vpop.f32.mrb[3].mxu0 }
 0x1fa   :  { %v512_v53 = vadd.f32 %v2796_v50, %v501_v52  ;;  %v519_v54 = vmul.f32 %v501_v52, %v501_v52 }
 0x1fc   :  { %v513_v55 = vrot.slane %v512_v53, 4  ;;  %v521_v56 = vadd.f32 %v520_v51, %v519_v54  ;;  %v795_v51 = vld [vmem:[%s4194_s6 + $0x60] sm:$0xff]  ;;  %v797_v54 = vld [vmem:[%s4194_s6 + $0x70] sm:$0xff] }
 0x1fe   :  { %v514_v57 = vadd.f32 %v513_v55, %v512_v53  ;;  %v522_v62 = vrot.slane %v521_v56, 4  ;;  %v798_v55 = vld [vmem:[%s4194_s6 + $0x78] sm:$0xff] }
 0x200   :  { %v515_v58 = vrot.slane %v514_v57, 2  ;;  %v523_v63 = vadd.f32 %v522_v62, %v521_v56  ;;  %v3296_v56 = vpack.c.bf16 %v798_v55, %v797_v54 }
 0x202   :  { %v516_v59 = vadd.f32 %v515_v58, %v514_v57 }
 0x204   :  { %v517_v60 = vrot.slane %v516_v59, 1 }
 0x206   :  { %v518_v61 = vadd.f32 %v517_v60, %v516_v59  ;;  %v1028_v59 = vld [vmem:[%s4196_s7] sm:$0xff]  ;;  %v1029_v60 = vld [vmem:[%s4196_s7 + $0x8] sm:$0xff] }
 0x207   :  { %v3299_v62 = vpack.c.bf16 %v1029_v60, %v1028_v59 }
 0x208   :  { %2830 = vmatmul.mubr.f32.vlgmr.msra.gmra.mrb[2].mxu1 %v518_v61  ;;  %v1030_v61 = vld [vmem:[%s4196_s7 + $0x10] sm:$0xff] }
 0x209   :  { %3249 = vmatpush3.bf16.msra.mxu1 %v3625_v38  ;;  %2864 = vmatprep.mubr.msk.f32.mxu1 %vm3426_vm1, %v3427_v49  ;;  %v524_v38 = vrot.slane %v523_v63, 2 }
 0x20a   :  { %3250 = vmatprep.subr.bf16.mxu1 %v3425_v34 }
 0x20d   :  { %3252 = vmatpush3.bf16.msra.mxu1 %v3631_v40  ;;  %v525_v40 = vadd.f32 %v524_v38, %v523_v63  ;;  %v1031_v63 = vld [vmem:[%s4196_s7 + $0x18] sm:$0xff] }
 0x20e   :  { %3253 = vmatprep.subr.bf16.mxu1 %v3425_v34  ;;  %v3302_v38 = vpack.c.bf16 %v1031_v63, %v1030_v61 }
 0x211   :  { %3255 = vmatpush3.bf16.msra.mxu1 %v3641_v43  ;;  %v526_v43 = vrot.slane %v525_v40, 1 }
 0x212   :  { %3256 = vmatprep.subr.bf16.mxu1 %v3425_v34 }
 0x213   :  { %v527_v0 = vadd.f32 %v526_v43, %v525_v40  ;;  %v1032_v40 = vld [vmem:[%s4196_s7 + $0x20] sm:$0xff]  ;;  %v1033_v43 = vld [vmem:[%s4196_s7 + $0x28] sm:$0xff] }
 0x215   :  { %3258 = vmatpush3.bf16.msra.mxu1 %v3651_v46 }
 0x216   :  { %3259 = vmatprep.subr.bf16.mxu1 %v3425_v34 }
 0x219   :  { %3261 = vmatpush3.bf16.msra.mxu1 %v3236_v35  ;;  %v788_v35 = vld [vmem:[%s4194_s6 + $0x28] sm:$0xff] }
 0x21a   :  { %3262 = vmatprep.subr.bf16.mxu1 %v3425_v34  ;;  %v3281_v36 = vpack.c.bf16 %v788_v35, %v787_v33  ;;  %v2431_v35 = vld [vmem:[%s4196_s7 + $0xa0] sm:$0xff] }
 0x21d   :  { %3264 = vmatpush3.bf16.msra.mxu1 %v3239_v39  ;;  %v790_v39 = vld [vmem:[%s4194_s6 + $0x38] sm:$0xff] }
 0x21e   :  { %3265 = vmatprep.subr.bf16.mxu1 %v3425_v34  ;;  %v3284_v41 = vpack.c.bf16 %v790_v39, %v789_v37  ;;  %v2433_v39 = vld [vmem:[%s4196_s7 + $0xb0] sm:$0xff] }
 0x221   :  { %3267 = vmatpush3.bf16.msra.mxu1 %v3242_v44  ;;  %v792_v44 = vld [vmem:[%s4194_s6 + $0x48] sm:$0xff] }
 0x222   :  { %3268 = vmatprep.subr.bf16.mxu1 %v3425_v34  ;;  %v3287_v45 = vpack.c.bf16 %v792_v44, %v791_v42  ;;  %v1283_v44 = vld [vmem:[%s4198_s9 + $0x10] sm:$0xff] }
 0x225   :  { %3270 = vmatpush3.bf16.msra.mxu1 %v3245_v48  ;;  %v794_v48 = vld [vmem:[%s4194_s6 + $0x58] sm:$0xff] }
 0x226   :  { %3271 = vmatprep.subr.bf16.mxu1 %v3425_v34 }
 0x228   :  { %2865 = vmatmul.mubr.f32.vlgmr.msra.gmra.mrb[4].mxu1 %v527_v0  ;;  %v3305_v0 = vpack.c.bf16 %v1033_v43, %v1032_v40 }
 0x229   :  { %2871 = vmatprep.mubr.msk.f32.mxu1 %vm3426_vm1, %v3427_v49 }
 0x2db   :  { %v610_v46 = vpop.f32.mrb[2].mxu1 }
 0x2dc   :  { %v2831_v2 = vpop.f32.mrb[3].mxu1  ;;  %v614_v3 = vmul.f32 0.001953125, %v610_v46  ;;  %v1034_v46 = vld [vmem:[%s4196_s7 + $0x30] sm:$0xff] }
 0x2dd   :  { %v1035_v2 = vld [vmem:[%s4196_s7 + $0x38] sm:$0xff] }
 0x2de   :  { %v686_v5 = vmul.f32 %v614_v3, %v614_v3 }
 0x2fb   :  { %v681_v4 = vpop.f32.mrb[4].mxu1 }
 0x2fc   :  { %v685_v6 = vmul.f32 0.001953125, %v681_v4  ;;  %v2866_v7 = vpop.f32.mrb[5].mxu1  ;;  %v878_v4 = vld [vmem:[%s4197_s8] sm:$0xff] }
 0x2fd   :  { %v2423_v7 = vld [vmem:[%s4197_s8 + $0x8] sm:$0xff] }
 0x2fe   :  { %v687_v8 = vsub.f32 %v685_v6, %v686_v5 }
 0x300   :  { %v689_v9 = vadd.f32 1e-05, %v687_v8  ;;  %v1281_v8 = vld [vmem:[%s4198_s9] sm:$0xff] }
 0x302   :  { %3419 = vrsqrt.f32 %v689_v9  ;;  %v1282_v9 = vld [vmem:[%s4198_s9 + $0x8] sm:$0xff] }
 0x303   :  { %v3922_v10 = vpack.c.bf16 %v1282_v9, %v1281_v8 }
 0x30c   :  { %v3420_v14 = vpop.eup %3419 }
 0x30d   :  { %v691_v15 = vmul.f32 %v3420_v14, %v688_v12 }
 0x30f   :  { %v692_v16 = vmul.f32 %v691_v15, %v614_v3  ;;  %v700_v17 = vrot.slane %v691_v15, %v3803_v13  ;;  %v3308_v3 = vpack.c.bf16 %v1035_v2, %v1034_v46  ;;  %v2416_v15 = vld [vmem:[%s4196_s7 + $0x50] sm:$0xff] }
 0x311   :  { %v694_v18 = vrot.slane %v692_v16, 7  ;;  %v701_v19 = vmul.f32 %v700_v17, %v501_v52  ;;  %v702_v20 = vmul.f32 %v2796_v50, %v700_v17  ;;  %v3290_v50 = vpack.c.bf16 %v794_v48, %v793_v47  ;;  %v796_v52 = vld [vmem:[%s4194_s6 + $0x68] sm:$0xff]  ;;  %v2417_v16 = vld [vmem:[%s4196_s7 + $0x58] sm:$0xff]  ;;  %v1285_v48 = vld [vmem:[%s4198_s9 + $0x20] sm:$0xff] }
 0x312   :  { %v3293_v53 = vpack.c.bf16 %v796_v52, %v795_v51  ;;  %v1287_v52 = vld [vmem:[%s4198_s9 + $0x30] sm:$0xff] }
 0x313   :  { %v696_v1 = vsub.f32 %v688_v12, %v694_v18  ;;  %v2415_v12 = vld [vmem:[%s4196_s7 + $0x48] sm:$0xff] }
 0x314   :  { %v3311_v14 = vpack.c.bf16 %v2415_v12, %v2414_v11 }
 0x315   :  { %v706_v22 = vrot.slane %v696_v1, %v3806_v21  ;;  %v2419_v1 = vld [vmem:[%s4196_s7 + $0x68] sm:$0xff] }
 0x317   :  { %v707_v23 = vadd.f32 %v706_v22, %v701_v19  ;;  %v708_v24 = vadd.f32 %v706_v22, %v702_v20  ;;  %v3314_v19 = vpack.c.bf16 %v2417_v16, %v2416_v15  ;;  %v2418_v20 = vld [vmem:[%s4196_s7 + $0x60] sm:$0xff] }
 0x318   :  { %v1439_v15 = vld [vmem:[%s4199_s10] sm:$0x3] }
 0x319   :  { %v3272_v27 = vpack.c.bf16 %v708_v24, %v707_v23  ;;  %v3317_v24 = vpack.c.bf16 %v2419_v1, %v2418_v20 }
 0x31b   :  { %3273 = vmatpush3.bf16.msra.mxu1 %v3272_v27  ;;  %v3320_v27 = vpack.c.bf16 %v2421_v26, %v2420_v25 }
 0x31c   :  { %3274 = vmatprep.subr.bf16.mxu1 %v3425_v34 }
 0x31e   :  { %2872 = vmatmul.mubr.msk.f32.vlgmr.msra.gmra.mrb[6].mxu1 %vm86_vm0, %v709_v28  ;;  %v2427_v28 = vld [vmem:[%s4196_s7 + $0x80] sm:$0xff] }
 0x31f   :  { %3276 = vmatpush3.bf16.msra.mxu1 %v3275_v29  ;;  %2906 = vmatprep.mubr.msk.f32.mxu1 %vm3426_vm1, %v3427_v49  ;;  %v2428_v29 = vld [vmem:[%s4196_s7 + $0x88] sm:$0xff] }
 0x320   :  { %3277 = vmatprep.subr.bf16.mxu1 %v3425_v34  ;;  %v3323_v30 = vpack.c.bf16 %v2428_v29, %v2427_v28  ;;  %v1534_v29 = vld [vmem:[%s4200_s12 + $0x10] sm:$0xff] }
 0x323   :  { %3279 = vmatpush3.bf16.msra.mxu1 %v3278_v32  ;;  %v2430_v32 = vld [vmem:[%s4196_s7 + $0x98] sm:$0xff] }
 0x324   :  { %3280 = vmatprep.subr.bf16.mxu1 %v3425_v34  ;;  %v3326_v33 = vpack.c.bf16 %v2430_v32, %v2429_v31  ;;  %v1536_v32 = vld [vmem:[%s4200_s12 + $0x20] sm:$0xff] }
 0x327   :  { %3282 = vmatpush3.bf16.msra.mxu1 %v3281_v36  ;;  %v2432_v36 = vld [vmem:[%s4196_s7 + $0xa8] sm:$0xff] }
 0x328   :  { %3283 = vmatprep.subr.bf16.mxu1 %v3425_v34  ;;  %v3329_v37 = vpack.c.bf16 %v2432_v36, %v2431_v35  ;;  %v1538_v36 = vld [vmem:[%s4200_s12 + $0x30] sm:$0xff] }
 0x32b   :  { %3285 = vmatpush3.bf16.msra.mxu1 %v3284_v41  ;;  %v2434_v41 = vld [vmem:[%s4196_s7 + $0xb8] sm:$0xff] }
 0x32c   :  { %3286 = vmatprep.subr.bf16.mxu1 %v3425_v34  ;;  %v3332_v42 = vpack.c.bf16 %v2434_v41, %v2433_v39 }
 0x32f   :  { %3288 = vmatpush3.bf16.msra.mxu1 %v3287_v45  ;;  %v1284_v45 = vld [vmem:[%s4198_s9 + $0x18] sm:$0xff] }
 0x330   :  { %3289 = vmatprep.subr.bf16.mxu1 %v3425_v34  ;;  %v3338_v47 = vpack.c.bf16 %v1284_v45, %v1283_v44  ;;  %v1773_v44 = vld [vmem:[%s4202_s13] sm:$0xff]  ;;  %v1774_v45 = vld [vmem:[%s4202_s13 + $0x8] sm:$0xff] }
 0x333   :  { %3291 = vmatpush3.bf16.msra.mxu1 %v3290_v50  ;;  %v1286_v50 = vld [vmem:[%s4198_s9 + $0x28] sm:$0xff] }
 0x334   :  { %3292 = vmatprep.subr.bf16.mxu1 %v3425_v34  ;;  %v3341_v51 = vpack.c.bf16 %v1286_v50, %v1285_v48  ;;  %v3371_v48 = vpack.c.bf16 %v1774_v45, %v1773_v44  ;;  %v1776_v50 = vld [vmem:[%s4202_s13 + $0x18] sm:$0xff] }
 0x337   :  { %3294 = vmatpush3.bf16.msra.mxu1 %v3293_v53  ;;  %v1288_v53 = vld [vmem:[%s4198_s9 + $0x38] sm:$0xff] }
 0x338   :  { %3295 = vmatprep.subr.bf16.mxu1 %v3425_v34  ;;  %v3344_v54 = vpack.c.bf16 %v1288_v53, %v1287_v52  ;;  %v1619_v52 = vld [vmem:[%s4203_s14] sm:$0xf] }
 0x33b   :  { %3297 = vmatpush3.bf16.msra.mxu1 %v3296_v56 }
 0x33c   :  { %3298 = vmatprep.subr.bf16.mxu1 %v3425_v34 }
 0x3f1   :  { %v779_v57 = vpop.f32.mrb[6].mxu1 }
 0x3f2   :  { %v2873_v58 = vpop.f32.mrb[7].mxu1  ;;  %2907 = vmatmul.mubr.f32.vlgmr.msra.gmra.mrb[8].mxu1 %v779_v57 }
 0x3f3   :  { %2935 = vmatprep.mubr.msk.f32.mxu1 %vm3426_vm1, %v3427_v49  ;;  %3300 = vmatpush3.bf16.msra.mxu1 %v3299_v62 }
 0x3f4   :  { %3301 = vmatprep.subr.bf16.mxu1 %v3425_v34 }
 0x3f7   :  { %3303 = vmatpush3.bf16.msra.mxu1 %v3302_v38 }
 0x3f8   :  { %3304 = vmatprep.subr.bf16.mxu1 %v3425_v34 }
 0x3fb   :  { %3306 = vmatpush3.bf16.msra.mxu1 %v3305_v0 }
 0x3fc   :  { %3307 = vmatprep.subr.bf16.mxu1 %v3425_v34 }
 0x3ff   :  { %3309 = vmatpush3.bf16.msra.mxu1 %v3308_v3 }
 0x400   :  { %3310 = vmatprep.subr.bf16.mxu1 %v3425_v34 }
 0x4c5   :  { %v865_v5 = vpop.f32.mrb[8].mxu1 }
 0x4c6   :  { %v2908_v6 = vpop.f32.mrb[9].mxu1  ;;  %2910 = vmatpush3.msra.mxu0 %v865_v5 }
 0x4c7   :  { %2912 = vmatmul.mubr.msk.f32.vlgmr.msra.gmra.mrb[4].mxu0 %vm879_vm2, %v878_v4  ;;  %2914 = vmatprep.subr.mxu0 %v3427_v49 }
 0x4c8   :  { %2915 = vmatpush3.msra.mxu0 %v865_v5  ;;  %2916 = vmatprep.mubr.msk.f32.mxu0 %vm3426_vm1, %v3427_v49 }
 0x4c9   :  { %3334 = vmatprep.subr.bf16.mxu0 %v3425_v34 }
 0x4cb   :  { %2917 = vmatmul.mubr.msk.f32.vlgmr.msra.gmra.mrb[6].mxu0 %vm879_vm2, %v2423_v7 }
 0x4cc   :  { %2992 = vmatprep.mubr.msk.f32.mxu0 %vm3426_vm1, %v3427_v49  ;;  %3336 = vmatpush3.bf16.msra.mxu0 %v3922_v10 }
 0x4cd   :  { %3337 = vmatprep.subr.bf16.mxu0 %v3425_v34 }
 0x4d0   :  { %3339 = vmatpush3.bf16.msra.mxu0 %v3338_v47 }
 0x4d1   :  { %3340 = vmatprep.subr.bf16.mxu0 %v3425_v34 }
 0x4d4   :  { %3342 = vmatpush3.bf16.msra.mxu0 %v3341_v51 }
 0x4d5   :  { %3343 = vmatprep.subr.bf16.mxu0 %v3425_v34 }
 0x4d8   :  { %3345 = vmatpush3.bf16.msra.mxu0 %v3344_v54 }
 0x4d9   :  { %3346 = vmatprep.subr.bf16.mxu0 %v3425_v34 }
 0x59a   :  { %v949_v17 = vpop.f32.mrb[4].mxu0 }
 0x59b   :  { %v2913_v18 = vpop.f32.mrb[5].mxu0  ;;  %2936 = vmatmul.mubr.msk.f32.vlgmr.msra.gmra.mrb[10].mxu1 %vm1036_vm3, %v949_v17 }
 0x59c   :  { %3312 = vmatpush3.bf16.msra.mxu1 %v3311_v14  ;;  %2954 = vmatprep.mubr.msk.f32.mxu1 %vm3426_vm1, %v3427_v49 }
 0x59d   :  { %3313 = vmatprep.subr.bf16.mxu1 %v3425_v34 }
 0x59e   :  { %v1024_v22 = vpop.f32.mrb[6].mxu0 }
 0x59f   :  { %v2918_v23 = vpop.f32.mrb[7].mxu0 }
 0x5a0   :  { %3315 = vmatpush3.bf16.msra.mxu1 %v3314_v19  ;;  %v1532_v23 = vld [vmem:[%s4200_s12] sm:$0xff] }
 0x5a1   :  { %3316 = vmatprep.subr.bf16.mxu1 %v3425_v34 }
 0x5a4   :  { %3318 = vmatpush3.bf16.msra.mxu1 %v3317_v24  ;;  %v1533_v24 = vld [vmem:[%s4200_s12 + $0x8] sm:$0xff] }
 0x5a5   :  { %3319 = vmatprep.subr.bf16.mxu1 %v3425_v34  ;;  %v3359_v28 = vpack.c.bf16 %v1533_v24, %v1532_v23 }
 0x5a8   :  { %3321 = vmatpush3.bf16.msra.mxu1 %v3320_v27  ;;  %v1458_v27 = vld [vmem:[%s4201_s11] sm:$0xf] }
 0x5a9   :  { %3322 = vmatprep.subr.bf16.mxu1 %v3425_v34 }
 0x5ab   :  { %2955 = vmatmul.mubr.msk.f32.vlgmr.msra.gmra.mrb[10].mxu1 %vm1036_vm3, %v865_v5 }
 0x5ac   :  { %3324 = vmatpush3.bf16.msra.mxu1 %v3323_v30  ;;  %2973 = vmatprep.mubr.msk.f32.mxu1 %vm3426_vm1, %v3427_v49  ;;  %v1535_v30 = vld [vmem:[%s4200_s12 + $0x18] sm:$0xff] }
 0x5ad   :  { %3325 = vmatprep.subr.bf16.mxu1 %v3425_v34  ;;  %v3362_v31 = vpack.c.bf16 %v1535_v30, %v1534_v29 }
 0x5b0   :  { %3327 = vmatpush3.bf16.msra.mxu1 %v3326_v33  ;;  %v1537_v33 = vld [vmem:[%s4200_s12 + $0x28] sm:$0xff] }
 0x5b1   :  { %3328 = vmatprep.subr.bf16.mxu1 %v3425_v34  ;;  %v3365_v35 = vpack.c.bf16 %v1537_v33, %v1536_v32 }
 0x5b4   :  { %3330 = vmatpush3.bf16.msra.mxu1 %v3329_v37  ;;  %v1539_v37 = vld [vmem:[%s4200_s12 + $0x38] sm:$0xff] }
 0x5b5   :  { %3331 = vmatprep.subr.bf16.mxu1 %v3425_v34  ;;  %v3368_v39 = vpack.c.bf16 %v1539_v37, %v1538_v36  ;;  %v2198_v36 = vld [vmem:[%s4206_s18] sm:$0xff] }
 0x5b8   :  { %3333 = vmatpush3.bf16.msra.mxu1 %v3332_v42 }
 0x5b9   :  { %3038 = vmatprep.subr.mxu1 %v3427_v49 }
 0x5bb   :  { %2974 = vmatmul.mubr.msk.f32.vlgmr.msra.gmra.mrb[10].mxu1 %vm1036_vm3, %v1024_v22 }
 0x5bc   :  { %3040 = vmatprep.mubr.msk.f32.mxu1 %vm3426_vm1, %v3427_v49 }
 0x68e   :  { %v1261_v55 = vpop.f32.mrb[10].mxu1 }
 0x68f   :  { %v1266_v56 = vsel %vm1036_vm3, %v1261_v55, 0.0  ;;  %v1273_v57 = vmul.f32 %v1261_v55, %v1261_v55  ;;  %v2975_v58 = vpop.f32.mrb[11].mxu1 }
 0x690   :  { %v1267_v59 = vrot.slane %v1266_v56, 4 }
 0x691   :  { %v1274_v61 = vsel %vm1036_vm3, %v1273_v57, 0.0  ;;  %v2446_v57 = vld [vmem:[%s4203_s14 + $0x4] sm:$0xf] }
 0x692   :  { %v1268_v60 = vadd.f32 %v1267_v59, %v1266_v56  ;;  %v1275_v38 = vrot.slane %v1274_v61, 4  ;;  %v2442_v59 = vld [vmem:[%s4202_s13 + $0x30] sm:$0xff] }
 0x694   :  { %v1269_v62 = vrot.slane %v1268_v60, 2  ;;  %v1276_v0 = vadd.f32 %v1275_v38, %v1274_v61 }
 0x696   :  { %v1270_v63 = vadd.f32 %v1269_v62, %v1268_v60  ;;  %v1277_v46 = vrot.slane %v1276_v0, 2  ;;  %v2443_v60 = vld [vmem:[%s4202_s13 + $0x38] sm:$0xff]  ;;  %v2451_v62 = vld [vmem:[%s4202_s13 + $0x40] sm:$0xff] }
 0x697   :  { %v3380_v61 = vpack.c.bf16 %v2443_v60, %v2442_v59  ;;  %v2285_v59 = vld [vmem:[%s4208_s19 + $0x8] sm:$0xff] }
 0x698   :  { %v1271_v40 = vrot.slane %v1270_v63, 1  ;;  %v1278_v2 = vadd.f32 %v1277_v46, %v1276_v0 }
 0x69a   :  { %v1272_v43 = vadd.f32 %v1271_v40, %v1270_v63  ;;  %v1279_v3 = vrot.slane %v1278_v2, 1  ;;  %v2452_v63 = vld [vmem:[%s4202_s13 + $0x48] sm:$0xff]  ;;  %v2453_v40 = vld [vmem:[%s4202_s13 + $0x50] sm:$0xff] }
 0x69b   :  { %v3383_v38 = vpack.c.bf16 %v2452_v63, %v2451_v62  ;;  %v2286_v62 = vld [vmem:[%s4208_s19 + $0x10] sm:$0xff] }
 0x69c   :  { %2993 = vmatmul.mubr.msk.f32.vlgmr.msra.gmra.mrb[8].mxu0 %vm1036_vm3, %v1272_v43  ;;  %v1280_v4 = vadd.f32 %v1279_v3, %v1278_v2  ;;  %v2454_v43 = vld [vmem:[%s4202_s13 + $0x58] sm:$0xff] }
 0x69d   :  { %3348 = vmatpush3.bf16.msra.mxu0 %v3922_v10  ;;  %3011 = vmatprep.mubr.msk.f32.mxu0 %vm3426_vm1, %v3427_v49  ;;  %v3386_v2 = vpack.c.bf16 %v2454_v43, %v2453_v40  ;;  %v2199_v40 = vld [vmem:[%s4206_s18 + $0x8] sm:$0xff] }
 0x69e   :  { %3349 = vmatprep.subr.bf16.mxu0 %v3425_v34 }
 0x6a1   :  { %3351 = vmatpush3.bf16.msra.mxu0 %v3338_v47  ;;  %v1775_v47 = vld [vmem:[%s4202_s13 + $0x10] sm:$0xff] }
 0x6a2   :  { %3352 = vmatprep.subr.bf16.mxu0 %v3425_v34 }
 0x6a5   :  { %3354 = vmatpush3.bf16.msra.mxu0 %v3341_v51  ;;  %v3374_v51 = vpack.c.bf16 %v1776_v50, %v1775_v47 }
 0x6a6   :  { %3355 = vmatprep.subr.bf16.mxu0 %v3425_v34 }
 0x6a9   :  { %3357 = vmatpush3.bf16.msra.mxu0 %v3344_v54  ;;  %v2440_v54 = vld [vmem:[%s4202_s13 + $0x20] sm:$0xff] }
 0x6aa   :  { %3014 = vmatprep.subr.mxu0 %v3427_v49 }
 0x6ac   :  { %3012 = vmatmul.mubr.msk.f32.vlgmr.msra.gmra.mrb[10].mxu0 %vm1036_vm3, %v1280_v4 }
 0x6ad   :  { %3016 = vmatprep.mubr.msk.f32.mxu0 %vm3426_vm1, %v3427_v49 }
 0x76f   :  { %v1358_v5 = vpop.f32.mrb[8].mxu0 }
 0x770   :  { %v2994_v6 = vpop.f32.mrb[9].mxu0  ;;  %v1362_v7 = vmul.f32 0.0078125, %v1358_v5 }
 0x772   :  { %v1437_v9 = vmul.f32 %v1362_v7, %v1362_v7 }
 0x77f   :  { %v1432_v8 = vpop.f32.mrb[10].mxu0 }
 0x780   :  { %v1436_v10 = vmul.f32 0.0078125, %v1432_v8  ;;  %v3013_v11 = vpop.f32.mrb[11].mxu0  ;;  %v2026_v8 = vld [vmem:[%s4204_s16 + $0x8] sm:$0xff] }
 0x782   :  { %v1438_v12 = vsub.f32 %v1436_v10, %v1437_v9  ;;  %v2027_v10 = vld [vmem:[%s4204_s16 + $0x10] sm:$0xff] }
 0x784   :  { %v1440_v14 = vadd.f32 1e-05, %v1438_v12 }
 0x786   :  { %3421 = vrsqrt.f32 %v1440_v14 }
 0x790   :  { %v3422_v16 = vpop.eup %3421 }
 0x791   :  { %v1442_v17 = vmul.f32 %v3422_v16, %v1439_v15  ;;  %v2456_v16 = vld [vmem:[%s4205_s15] ss:$0 sm:$0xff] }
 0x793   :  { %v1443_v18 = vmul.f32 %v1442_v17, %v1362_v7  ;;  %v1451_v19 = vrot.slane %v1442_v17, %v3803_v13  ;;  %v2025_v7 = vld [vmem:[%s4204_s16] sm:$0xff] }
 0x794   :  { %v3389_v9 = vpack.c.bf16 %v2026_v8, %v2025_v7 }
 0x795   :  { %v1445_v20 = vrot.slane %v1443_v18, 7  ;;  %v1452_v1 = vmul.f32 %v1451_v19, %v1261_v55  ;;  %v2441_v55 = vld [vmem:[%s4202_s13 + $0x28] sm:$0xff] }
 0x796   :  { %v3377_v58 = vpack.c.bf16 %v2441_v55, %v2440_v54 }
 0x797   :  { %v1447_v22 = vsub.f32 %v1439_v15, %v1445_v20 }
 0x799   :  { %v1456_v25 = vrot.slane %v1447_v22, %v3806_v21 }
 0x79b   :  { %v1457_v26 = vadd.f32 %v1456_v25, %v1452_v1 }
 0x79d   :  { %3015 = vmatpush3.msra.mxu0 %v1457_v26 }
 0x79e   :  { %3017 = vmatmul.mubr.msk.f32.vlgmr.msra.gmra.mrb[12].mxu0 %vm879_vm2, %v1458_v27  ;;  %3358 = vmatprep.subr.bf16.mxu0 %v3425_v34 }
 0x79f   :  { %3360 = vmatpush3.bf16.msra.mxu0 %v3359_v28  ;;  %3035 = vmatprep.mubr.msk.f32.mxu0 %vm3426_vm1, %v3427_v49 }
 0x7a0   :  { %3361 = vmatprep.subr.bf16.mxu0 %v3425_v34 }
 0x7a3   :  { %3363 = vmatpush3.bf16.msra.mxu0 %v3362_v31 }
 0x7a4   :  { %3364 = vmatprep.subr.bf16.mxu0 %v3425_v34 }
 0x7a7   :  { %3366 = vmatpush3.bf16.msra.mxu0 %v3365_v35 }
 0x7a8   :  { %3367 = vmatprep.subr.bf16.mxu0 %v3425_v34 }
 0x7ab   :  { %3369 = vmatpush3.bf16.msra.mxu0 %v3368_v39 }
 0x7ac   :  { %3370 = vmatprep.subr.bf16.mxu0 %v3425_v34 }
 0x871   :  { %v1528_v41 = vpop.f32.mrb[12].mxu0 }
 0x872   :  { %v3018_v42 = vpop.f32.mrb[13].mxu0  ;;  %3036 = vmatmul.mubr.msk.f32.vlgmr.msra.gmra.mrb[14].mxu0 %vm1036_vm3, %v1528_v41 }
 0x873   :  { %3056 = vmatprep.mubr.msk.f32.mxu0 %vm3426_vm1, %v3427_v49  ;;  %3372 = vmatpush3.bf16.msra.mxu0 %v3371_v48 }
 0x874   :  { %3373 = vmatprep.subr.bf16.mxu0 %v3425_v34 }
 0x877   :  { %3375 = vmatpush3.bf16.msra.mxu0 %v3374_v51  ;;  %v2179_v51 = vld [vmem:[%s4207_s17] sm:$0x3] }
 0x878   :  { %3382 = vmatprep.subr.bf16.mxu0 %v3425_v34 }
 0x945   :  { %v1609_v53 = vpop.f32.mrb[14].mxu0 }
 0x946   :  { %v3037_v56 = vpop.f32.mrb[15].mxu0  ;;  %3039 = vmatpush3.msk.msra.mxu1 %vm1624_vm4, %v1609_v53 }
 0x947   :  { %3041 = vmatmul.mubr.msk.f32.vlgmr.msra.gmra.mrb[12].mxu1 %vm1620_vm5, %v1619_v52  ;;  %3043 = vmatprep.subr.mxu1 %v3427_v49 }
 0x948   :  { %3044 = vmatpush3.msk.msra.mxu1 %vm1624_vm4, %v1609_v53  ;;  %3045 = vmatprep.mubr.msk.f32.mxu1 %vm3426_vm1, %v3427_v49 }
 0x949   :  { %3376 = vmatprep.subr.bf16.mxu1 %v3425_v34 }
 0x94b   :  { %3046 = vmatmul.mubr.msk.f32.vlgmr.msra.gmra.mrb[14].mxu1 %vm1620_vm5, %v2446_v57 }
 0x94c   :  { %3378 = vmatpush3.bf16.msra.mxu1 %v3377_v58  ;;  %3067 = vmatprep.mubr.msk.f32.mxu1 %vm3426_vm1, %v3427_v49  ;;  %v2284_v58 = vld [vmem:[%s4208_s19] sm:$0xff] }
 0x94d   :  { %3379 = vmatprep.subr.bf16.mxu1 %v3425_v34 }
 0x950   :  { %3381 = vmatpush3.bf16.msra.mxu1 %v3380_v61 }
 0x951   :  { %3388 = vmatprep.subr.bf16.mxu1 %v3425_v34 }
 0x953   :  { %3068 = vmatmul.mubr.msk.f32.vlgmr.msra.gmra.mrb[16].mxu1 %vm1777_vm6, %v1609_v53 }
 0x954   :  { %3089 = vmatprep.mubr.msk.f32.mxu1 %vm3426_vm1, %v3427_v49  ;;  %3390 = vmatpush3.bf16.msra.mxu1 %v3389_v9 }
 0x955   :  { %3391 = vmatprep.subr.bf16.mxu1 %v3425_v34 }
 0xa1a   :  { %v1694_v0 = vpop.f32.mrb[12].mxu1 }
 0xa1b   :  { %v3042_v46 = vpop.f32.mrb[13].mxu1  ;;  %3057 = vmatmul.mubr.msk.f32.vlgmr.msra.gmra.mrb[16].mxu0 %vm1777_vm6, %v1694_v0 }
 0xa1c   :  { %3384 = vmatpush3.bf16.msra.mxu0 %v3383_v38  ;;  %3078 = vmatprep.mubr.msk.f32.mxu0 %vm3426_vm1, %v3427_v49  ;;  %v3400_v38 = vpack.c.bf16 %v2285_v59, %v2284_v58 }
 0xa1d   :  { %3385 = vmatprep.subr.bf16.mxu0 %v3425_v34 }
 0xa1e   :  { %v1769_v3 = vpop.f32.mrb[14].mxu1 }
 0xa1f   :  { %v3047_v4 = vpop.f32.mrb[15].mxu1 }
 0xa20   :  { %3387 = vmatpush3.bf16.msra.mxu0 %v3386_v2 }
 0xa21   :  { %3394 = vmatprep.subr.bf16.mxu0 %v3425_v34 }
 0xa23   :  { %3079 = vmatmul.mubr.msk.f32.vlgmr.msra.gmra.mrb[18].mxu0 %vm1777_vm6, %v1769_v3 }
 0xa24   :  { %3100 = vmatprep.mubr.msk.f32.mxu0 %vm3426_vm1, %v3427_v49  ;;  %3396 = vmatpush3.bf16.msra.mxu0 %v3389_v9  ;;  %v2028_v49 = vld [vmem:[%s4204_s16 + $0x18] sm:$0xff] }
 0xa25   :  { %3397 = vmatprep.subr.bf16.mxu0 %v3425_v34  ;;  %v3392_v11 = vpack.c.bf16 %v2028_v49, %v2027_v10 }
 0xa26   :  { %v1919_v5 = vpop.f32.mrb[16].mxu1 }
 0xa27   :  { %v3069_v6 = vpop.f32.mrb[17].mxu1  ;;  %3393 = vmatpush3.bf16.msra.mxu1 %v3392_v11 }
 0xa28   :  { %3399 = vmatpush3.bf16.msra.mxu0 %v3392_v11 }
 0xaee   :  { %v1847_v12 = vpop.f32.mrb[16].mxu0 }
 0xaef   :  { %v1920_v14 = vadd.f32 %v1919_v5, %v1847_v12  ;;  %v3058_v15 = vpop.f32.mrb[17].mxu0 }
 0xaf6   :  { %v1997_v17 = vpop.f32.mrb[18].mxu0 }
 0xaf7   :  { %v2001_v18 = vadd.f32 %v1997_v17, %v1920_v14  ;;  %v3080_v19 = vpop.f32.mrb[19].mxu0 }
 0xaf9   :  { %v2008_v20 = vadd.f32 %v2456_v16, %v2001_v18 }
 0xafb   :  { %v2010_v1 = vsel %vm2009_vm7, %v2008_v20, 0.0  ;;  %v2017_v22 = vmul.f32 %v2008_v20, %v2008_v20 }
 0xafc   :  { %v2011_v23 = vrot.slane %v2010_v1, 4 }
 0xafd   :  { %v2018_v24 = vsel %vm2009_vm7, %v2017_v22, 0.0 }
 0xafe   :  { %v2012_v34 = vadd.f32 %v2011_v23, %v2010_v1  ;;  %v2019_v25 = vrot.slane %v2018_v24, 4 }
 0xb00   :  { %v2013_v26 = vrot.slane %v2012_v34, 2  ;;  %v2020_v27 = vadd.f32 %v2019_v25, %v2018_v24 }
 0xb02   :  { %v2014_v28 = vadd.f32 %v2013_v26, %v2012_v34  ;;  %v2021_v29 = vrot.slane %v2020_v27, 2 }
 0xb04   :  { %v2015_v30 = vrot.slane %v2014_v28, 1  ;;  %v2022_v31 = vadd.f32 %v2021_v29, %v2020_v27 }
 0xb06   :  { %v2016_v32 = vadd.f32 %v2015_v30, %v2014_v28  ;;  %v2023_v33 = vrot.slane %v2022_v31, 1 }
 0xb08   :  { %3090 = vmatmul.mubr.msk.f32.vlgmr.msra.gmra.mrb[18].mxu1 %vm1777_vm6, %v2016_v32  ;;  %v2024_v35 = vadd.f32 %v2023_v33, %v2022_v31 }
 0xb09   :  { %3105 = vmatprep.mubr.msk.f32.mxu1 %vm1620_vm5, %v2198_v36 }
 0xb0a   :  { %3101 = vmatmul.mubr.msk.f32.vlgmr.msra.gmra.mrb[20].mxu0 %vm1777_vm6, %v2024_v35 }
 0xbdb   :  { %v2098_v37 = vpop.f32.mrb[18].mxu1 }
 0xbdc   :  { %v2102_v39 = vmul.f32 0.03125, %v2098_v37  ;;  %v3091_v41 = vpop.f32.mrb[19].mxu1 }
 0xbdd   :  { %v2172_v42 = vpop.f32.mrb[20].mxu0 }
 0xbde   :  { %v2177_v44 = vmul.f32 %v2102_v39, %v2102_v39  ;;  %v2176_v45 = vmul.f32 0.03125, %v2172_v42  ;;  %v3102_v47 = vpop.f32.mrb[21].mxu0 }
 0xbe0   :  { %v2178_v48 = vsub.f32 %v2176_v45, %v2177_v44 }
 0xbe2   :  { %v2180_v50 = vadd.f32 1e-05, %v2178_v48 }
 0xbe4   :  { %3423 = vrsqrt.f32 %v2180_v50 }
 0xbee   :  { %v3424_v52 = vpop.eup %3423 }
 0xbef   :  { %v2182_v53 = vmul.f32 %v3424_v52, %v2179_v51 }
 0xbf1   :  { %v2183_v54 = vmul.f32 %v2182_v53, %v2102_v39  ;;  %v2191_v56 = vrot.slane %v2182_v53, %v3803_v13  ;;  %v2287_v13 = vld [vmem:[%s4208_s19 + $0x18] sm:$0xff] }
 0xbf2   :  { %v3404_v43 = vpack.c.bf16 %v2287_v13, %v2286_v62 }
 0xbf3   :  { %v2185_v55 = vrot.slane %v2183_v54, 7  ;;  %v2192_v60 = vmul.f32 %v2191_v56, %v2008_v20 }
 0xbf5   :  { %v2187_v57 = vsub.f32 %v2179_v51, %v2185_v55 }
 0xbf7   :  { %v2196_v61 = vrot.slane %v2187_v57, %v3806_v21 }
 0xbf9   :  { %v2197_v63 = vadd.f32 %v2196_v61, %v2192_v60 }
 0xbfb   :  { %3103 = vmatprep.subr.msk.mxu1 %vm1624_vm4, %v2197_v63 }
 0xbfc   :  { %3104 = vmatpush3.msk.msra.mxu1 %vm1624_vm4, %v2197_v63 }
 0xbfd   :  { %3106 = vmatmul.mubr.msk.f32.vlgmr.msra.gmra.mrb[20].mxu1 %vm1620_vm5, %v2199_v40  ;;  %3401 = vmatprep.subr.bf16.mxu1 %v3400_v38 }
 0xbfe   :  { %3403 = vmatpush3.bf16.msra.mxu1 %v3400_v38 }
 0xbff   :  { %3405 = vmatprep.subr.bf16.mxu1 %v3404_v43 }
 0xc02   :  { %3407 = vmatpush3.bf16.msra.mxu1 %v3404_v43 }
 0xcd0   :  { %v3107_v21 = vpop.f32.mrb[20].mxu1 }
 0xcd1   :  { %v2275_v0 = vpop.f32.mrb[21].mxu1 }
 0xcd2   :  { %3116 = vmatprep.mubr.msk.f32.mxu1 %vm1777_vm6, %v2275_v0 }
 0xcd3   :  { %3117 = vmatmul.mubr.msk.f32.vlgmr.msra.gmra.mrb[22].mxu1 %vm1777_vm6, %v3107_v21 }
 0xda6   :  { %v3118_v46 = vpop.f32.mrb[22].mxu1 }
 0xda7   :  { %2370 = vst [vmem:[%s4209_s20 + $0x8] sm:$0xff] %v3118_v46  ;;  %v2360_v2 = vpop.f32.mrb[23].mxu1 }
 0xda8   :  { %2369 = vst [vmem:[%s4209_s20] sm:$0xff] %v2360_v2 }

</bundles_post_ra>
